<compile_context>
chip_gen: v6e
topology: v6e:2x2x1
jax: 0.10.0
libtpu: 0.0.40
codegen_flags: <defaults>
</compile_context>

<pallas_src>
import functools

import jax
import jax.numpy as jnp
from jax.experimental import pallas as pl
from jax.experimental.pallas import tpu as pltpu


# --------------------------------------------------------------------------- #
# Helpers                                                                      #
# --------------------------------------------------------------------------- #
def _round_up(x, m):
    return ((x + m - 1) // m) * m


def _sigmoid(x):
    # tanh-based sigmoid: a single EUP op per gate instead of exp + divide.
    return 0.5 * (jnp.tanh(0.5 * x) + 1.0)


def _pick_batch_tile(bp):
    if bp <= 256:
        return bp
    for cand in (256, 128, 64, 32, 16):
        if bp % cand == 0:
            return cand
    return bp


def _pick_time_chunk(seq_len, bt, in_p, hidden_p, d_out, mxu_itemsize,
                     cap=32, budget_bytes=8 * 1024 * 1024):
    """Largest time chunk whose per-chunk VMEM footprint fits the budget.

    Budget is kept well under the conservative 32 MiB scoped-VMEM limit so the
    same tiling is safe on v7x (64 MiB physical) as well as v5e/v6e (128 MiB).
    """
    t = max(1, min(seq_len, cap))
    while t > 1:
        chunk_bytes = (
            2 * t * bt * in_p * mxu_itemsize        # x block (double-buffered)
            + 2 * t * bt * d_out * 4                # out block (double-buffered)
            + t * bt * 4 * hidden_p * 4             # hoisted-gates scratch
            + t * bt * hidden_p * 4)                # h-sequence scratch
        if chunk_bytes <= budget_bytes:
            break
        t = max(1, t // 2)
    return t


# --------------------------------------------------------------------------- #
# LSTM chunk kernel: one grid step == T timesteps of one batch tile.           #
# --------------------------------------------------------------------------- #
def _lstm_chunk_kernel(*refs, chunk, seq_len, hidden_p, mxu_dtype,
                       fuse_head, mask_tail):
    if fuse_head:
        (x_ref, h0_ref, c0_ref, wih_ref, whh_ref, b_ref, wout_ref, bout_ref,
         out_ref, hn_ref, cn_ref,
         h_scr, c_scr, gx_scr, hseq_scr) = refs
    else:
        (x_ref, h0_ref, c0_ref, wih_ref, whh_ref, b_ref,
         out_ref, hn_ref, cn_ref,
         h_scr, c_scr, gx_scr, hseq_scr) = refs
        wout_ref = bout_ref = None

    ni = pl.program_id(1)                      # sequential time-chunk index
    Hp = hidden_p
    T, BT, in_p = x_ref.shape

    @pl.when(ni == 0)
    def _():
        h_scr[...] = h0_ref[...].astype(jnp.float32)
        c_scr[...] = c0_ref[...].astype(jnp.float32)

    # ---- Hoisted input projection: one (T*BT, in) x (in, 4*Hp) MXU GEMM ----
    x2d = x_ref[...].reshape(T * BT, in_p).astype(mxu_dtype)
    gx = jnp.dot(x2d, wih_ref[...],
                 preferred_element_type=jnp.float32) + b_ref[...]
    gx_scr[...] = gx.reshape(T, BT, 4 * Hp)

    # ---- Sequential recurrence: only h @ W_hh + elementwise per timestep ----
    def step(t, carry):
        h, c = carry                                           # f32 (BT, Hp)
        gates = gx_scr[t] + jnp.dot(h.astype(mxu_dtype), whh_ref[...],
                                    preferred_element_type=jnp.float32)
        # PyTorch gate order [i, f, g, o]; gate blocks are lane-aligned (Hp).
        i_g = _sigmoid(gates[:, 0 * Hp:1 * Hp])
        f_g = _sigmoid(gates[:, 1 * Hp:2 * Hp])
        g_g = jnp.tanh(gates[:, 2 * Hp:3 * Hp])
        o_g = _sigmoid(gates[:, 3 * Hp:4 * Hp])
        c_new = f_g * c + i_g * g_g
        h_new = o_g * jnp.tanh(c_new)
        if mask_tail:
            # Padded timesteps past seq_len must not advance the state.
            keep = ((ni * chunk + t) < seq_len).astype(jnp.float32)
            h_new = keep * h_new + (1.0 - keep) * h
            c_new = keep * c_new + (1.0 - keep) * c
        hseq_scr[t] = h_new
        return h_new, c_new

    h_fin, c_fin = jax.lax.fori_loop(
        0, chunk, step, (h_scr[...], c_scr[...]), unroll=True)

    h_scr[...] = h_fin
    c_scr[...] = c_fin
    hn_ref[...] = h_fin.astype(hn_ref.dtype)
    cn_ref[...] = c_fin.astype(cn_ref.dtype)

    # ---- Chunk epilogue: one lane-dense store (optionally fused head) ----
    hseq = hseq_scr[...]
    if fuse_head:
        y = jnp.dot(hseq.reshape(T * BT, Hp).astype(mxu_dtype), wout_ref[...],
                    preferred_element_type=jnp.float32) + bout_ref[...]
        out_ref[...] = jnp.tanh(y).reshape(T, BT, -1).astype(out_ref.dtype)
    else:
        out_ref[...] = hseq.astype(out_ref.dtype)


def _lstm_layer_call(x, h0, c0, wih, whh, b, *, head, time_chunk, seq_len,
                     hidden_p, batch_tile, mxu_dtype):
    """One LSTM layer over the (padded) sequence; optionally fuses the head.

    x:        (seq_pad, batch_p, in_p)   mxu_dtype
    h0, c0:   (batch_p, hidden_p)        f32
    wih:      (in_p, 4*hidden_p)         mxu_dtype (lane-aligned gate blocks)
    whh:      (hidden_p, 4*hidden_p)     mxu_dtype
    b:        (1, 4*hidden_p)            f32       (b_ih + b_hh, padded)
    head:     None or (wout (hidden_p, out_p) mxu_dtype, bout (1, out_p) f32)
    """
    seq_pad, bp, in_p = x.shape
    T = time_chunk
    num_chunks = seq_pad // T
    bt = batch_tile
    nbt = bp // bt
    fuse = head is not None
    if fuse:
        wout, bout = head
        d_out, o_dtype = wout.shape[1], jnp.float32
    else:
        d_out, o_dtype = hidden_p, mxu_dtype

    kernel = functools.partial(
        _lstm_chunk_kernel, chunk=T, seq_len=seq_len, hidden_p=hidden_p,
        mxu_dtype=mxu_dtype, fuse_head=fuse, mask_tail=(seq_pad != seq_len))

    in_specs = [
        pl.BlockSpec((T, bt, in_p), lambda bi, ni: (ni, bi, 0)),
        pl.BlockSpec((bt, hidden_p), lambda bi, ni: (bi, 0)),
        pl.BlockSpec((bt, hidden_p), lambda bi, ni: (bi, 0)),
        pl.BlockSpec((in_p, 4 * hidden_p), lambda bi, ni: (0, 0)),
        pl.BlockSpec((hidden_p, 4 * hidden_p), lambda bi, ni: (0, 0)),
        pl.BlockSpec((1, 4 * hidden_p), lambda bi, ni: (0, 0)),
    ]
    args = [x, h0, c0, wih, whh, b]
    if fuse:
        in_specs += [
            pl.BlockSpec((hidden_p, d_out), lambda bi, ni: (0, 0)),
            pl.BlockSpec((1, d_out), lambda bi, ni: (0, 0)),
        ]
        args += [wout, bout]

    grid_spec = pltpu.PrefetchScalarGridSpec(
        num_scalar_prefetch=0,
        grid=(nbt, num_chunks),
        in_specs=in_specs,
        out_specs=[
            pl.BlockSpec((T, bt, d_out), lambda bi, ni: (ni, bi, 0)),
            pl.BlockSpec((bt, hidden_p), lambda bi, ni: (bi, 0)),
            pl.BlockSpec((bt, hidden_p), lambda bi, ni: (bi, 0)),
        ],
        scratch_shapes=[
            pltpu.VMEM((bt, hidden_p), jnp.float32),          # h state
            pltpu.VMEM((bt, hidden_p), jnp.float32),          # c state
            pltpu.VMEM((T, bt, 4 * hidden_p), jnp.float32),   # hoisted gates
            pltpu.VMEM((T, bt, hidden_p), jnp.float32),       # h over chunk
        ],
    )

    out_shapes = (
        jax.ShapeDtypeStruct((seq_pad, bp, d_out), o_dtype),
        jax.ShapeDtypeStruct((bp, hidden_p), jnp.float32),
        jax.ShapeDtypeStruct((bp, hidden_p), jnp.float32),
    )

    return pl.pallas_call(
        kernel,
        out_shape=out_shapes,
        grid_spec=grid_spec,
        compiler_params=pltpu.CompilerParams(
            # batch tiles are independent -> "parallel" (uses both TCs on v7x);
            # the time-chunk axis carries the recurrence -> "arbitrary".
            dimension_semantics=("parallel", "arbitrary"),
            vmem_limit_bytes=32 * 1024 * 1024),
    )(*args)


# --------------------------------------------------------------------------- #
# RNNEstimator (Pallas)                                                        #
# --------------------------------------------------------------------------- #
class RNNEstimatorPallas:
    """Pallas/TPU port of rsl_rl RNNEstimator (LSTM + Linear + Tanh head)."""

    def __init__(self, input_size, output_size, type='lstm', num_layers=1,
                 hidden_size=256, privilege_mask=None, key=None,
                 mxu_dtype=jnp.bfloat16, time_chunk=None):
        # TODO(synk): only the LSTM branch is implemented (GRU cell not ported).
        assert type.lower() == 'lstm'
        self.input_size = input_size
        self.output_size = output_size
        self.num_layers = num_layers
        self.hidden_size = hidden_size
        self.privilege_mask = privilege_mask   # unused in forward (parity only)
        self.mxu_dtype = mxu_dtype
        self.time_chunk = time_chunk

        self.hidden_p = _round_up(hidden_size, 128)
        self.output_p = _round_up(output_size, 128)

        if key is None:
            key = jax.random.PRNGKey(42)
        k = 1.0 / jnp.sqrt(jnp.float32(hidden_size))

        # Raw parameters in PyTorch layout (also used by the pure-JAX reference).
        self.rnn_params = []
        in_sz = input_size
        for _ in range(num_layers):
            key, k1, k2, k3, k4 = jax.random.split(key, 5)
            w_ih = jax.random.uniform(k1, (4 * hidden_size, in_sz),
                                      jnp.float32, -k, k)
            w_hh = jax.random.uniform(k2, (4 * hidden_size, hidden_size),
                                      jnp.float32, -k, k)
            b_ih = jax.random.uniform(k3, (4 * hidden_size,),
                                      jnp.float32, -k, k)
            b_hh = jax.random.uniform(k4, (4 * hidden_size,),
                                      jnp.float32, -k, k)
            self.rnn_params.append((w_ih, w_hh, b_ih, b_hh))
            in_sz = hidden_size

        key, k5, k6 = jax.random.split(key, 3)
        self.w_out = jax.random.uniform(k5, (output_size, hidden_size),
                                        jnp.float32, -k, k)
        self.b_out = jax.random.uniform(k6, (output_size,), jnp.float32, -k, k)

        self._prepare_params()

    def _prepare_params(self):
        """Pad + transpose weights once: lane-aligned gate blocks, MXU dtype."""
        H, Hp = self.hidden_size, self.hidden_p
        self._layer_params = []
        for layer, (w_ih, w_hh, b_ih, b_hh) in enumerate(self.rnn_params):
            in_actual = w_ih.shape[1]
            in_p = in_actual if layer == 0 else Hp   # layers>0 consume padded h
            wih_p = jnp.zeros((in_p, 4 * Hp), jnp.float32)
            whh_p = jnp.zeros((Hp, 4 * Hp), jnp.float32)
            b_p = jnp.zeros((1, 4 * Hp), jnp.float32)
            wih_t, whh_t = w_ih.T, w_hh.T
            bsum = b_ih + b_hh
            for g in range(4):
                wih_p = wih_p.at[:in_actual, g * Hp:g * Hp + H].set(
                    wih_t[:, g * H:(g + 1) * H])
                whh_p = whh_p.at[:H, g * Hp:g * Hp + H].set(
                    whh_t[:, g * H:(g + 1) * H])
                b_p = b_p.at[0, g * Hp:g * Hp + H].set(bsum[g * H:(g + 1) * H])
            self._layer_params.append(
                (wih_p.astype(self.mxu_dtype), whh_p.astype(self.mxu_dtype),
                 b_p))

        Op = self.output_p
        wout_p = jnp.zeros((Hp, Op), jnp.float32)
        wout_p = wout_p.at[:H, :self.output_size].set(self.w_out.T)
        bout_p = jnp.zeros((1, Op), jnp.float32)
        bout_p = bout_p.at[0, :self.output_size].set(self.b_out)
        self._head_params = (wout_p.astype(self.mxu_dtype), bout_p)

    def forward(self, observations, h, c):
        """observations: (seq, batch, input); h, c: (num_layers, batch, hidden)."""
        seq_len, batch, _ = observations.shape
        H, Hp = self.hidden_size, self.hidden_p
        bp = _round_up(batch, 8)
        bt = _pick_batch_tile(bp)
        if self.time_chunk is not None:
            T = self.time_chunk
        else:
            T = _pick_time_chunk(seq_len, bt, max(self.input_size, Hp), Hp,
                                 max(Hp, self.output_p),
                                 jnp.dtype(self.mxu_dtype).itemsize)
        seq_pad = _round_up(seq_len, T)

        x = jnp.asarray(observations, jnp.float32)
        x = jnp.pad(x, ((0, seq_pad - seq_len), (0, bp - batch), (0, 0)))
        x = x.astype(self.mxu_dtype)

        h_p = jnp.pad(jnp.asarray(h, jnp.float32),
                      ((0, 0), (0, bp - batch), (0, Hp - H)))
        c_p = jnp.pad(jnp.asarray(c, jnp.float32),
                      ((0, 0), (0, bp - batch), (0, Hp - H)))

        h_n, c_n = [], []
        for layer in range(self.num_layers):
            wih, whh, b = self._layer_params[layer]
            head = self._head_params if layer == self.num_layers - 1 else None
            x, hl, cl = _lstm_layer_call(
                x, h_p[layer], c_p[layer], wih, whh, b, head=head,
                time_chunk=T, seq_len=seq_len, hidden_p=Hp, batch_tile=bt,
                mxu_dtype=self.mxu_dtype)
            h_n.append(hl[:batch, :H])
            c_n.append(cl[:batch, :H])

        latent = x[:seq_len, :batch, :self.output_size]
        return latent, jnp.stack(h_n), jnp.stack(c_n)


# --------------------------------------------------------------------------- #
# Pure-JAX reference (exact f32 module semantics, for correctness check).      #
# --------------------------------------------------------------------------- #
def _reference_forward(model, obs, h, c):
    def lstm_ref(x_seq, h0, c0, w_ih, w_hh, b_ih, b_hh):
        H = h0.shape[-1]

        def step(carry, x_t):
            hp, cp = carry
            g = x_t @ w_ih.T + hp @ w_hh.T + b_ih + b_hh
            i = jax.nn.sigmoid(g[:, 0 * H:1 * H])
            f = jax.nn.sigmoid(g[:, 1 * H:2 * H])
            gg = jnp.tanh(g[:, 2 * H:3 * H])
            o = jax.nn.sigmoid(g[:, 3 * H:4 * H])
            cn = f * cp + i * gg
            hn = o * jnp.tanh(cn)
            return (hn, cn), hn

        (hn, cn), out = jax.lax.scan(step, (h0, c0), x_seq)
        return out, hn, cn

    x = obs
    hs, cs = [], []
    for layer, p in enumerate(model.rnn_params):
        x, hl, cl = lstm_ref(x, h[layer], c[layer], *p)
        hs.append(hl)
        cs.append(cl)
    latent = jnp.tanh(x @ model.w_out.T + model.b_out)
    return latent, jnp.stack(hs), jnp.stack(cs)


if __name__ == "__main__":
    input_size, output_size = 16, 8
    hidden_size, num_layers = 32, 2
    seq_len, batch = 10, 2          # seq not a multiple of the chunk -> masking

    key = jax.random.PRNGKey(0)
    k_obs, k_h, k_c, k_model = jax.random.split(key, 4)
    obs = jax.random.normal(k_obs, (seq_len, batch, input_size), jnp.float32)
    h0 = jax.random.normal(k_h, (num_layers, batch, hidden_size), jnp.float32)
    c0 = jax.random.normal(k_c, (num_layers, batch, hidden_size), jnp.float32)

    # Production default: bf16 MXU operands, f32 accumulation / elementwise.
    model = RNNEstimatorPallas(input_size, output_size, type='lstm',
                               num_layers=num_layers, hidden_size=hidden_size,
                               key=k_model, mxu_dtype=jnp.bfloat16,
                               time_chunk=4)   # small chunk to exercise tiling
    latent, h_n, c_n = model.forward(obs, h0, c0)
    jax.block_until_ready((latent, h_n, c_n))

    latent_r, h_r, c_r = _reference_forward(model, obs, h0, c0)
    assert latent.shape == (seq_len, batch, output_size)
    assert h_n.shape == (num_layers, batch, hidden_size)
    assert c_n.shape == (num_layers, batch, hidden_size)
    # bf16 MXU inputs vs f32 reference -> loose tolerance.
    assert jnp.allclose(latent, latent_r, atol=5e-2, rtol=5e-2)
    assert jnp.allclose(h_n, h_r, atol=5e-2, rtol=5e-2)
    assert jnp.allclose(c_n, c_r, atol=5e-2, rtol=5e-2)

    # f32 MXU mode: tight structural check of the same kernels.
    model32 = RNNEstimatorPallas(input_size, output_size, type='lstm',
                                 num_layers=num_layers, hidden_size=hidden_size,
                                 key=k_model, mxu_dtype=jnp.float32,
                                 time_chunk=4)
    latent32, h32, c32 = model32.forward(obs, h0, c0)
    jax.block_until_ready((latent32, h32, c32))
    assert jnp.allclose(latent32, latent_r, atol=5e-3, rtol=5e-3)
    assert jnp.allclose(h32, h_r, atol=5e-3, rtol=5e-3)
    assert jnp.allclose(c32, c_r, atol=5e-3, rtol=5e-3)

    print("KERNEL_OK")
</pallas_src>

<mosaic_0001>
module attributes {stable_mosaic.version = 11 : i64} {
  func.func @_lstm_chunk_kernel(%arg0: i32, %arg1: i32, %arg2: memref<4x8x16xbf16, #tpu.memory_space<vmem>>, %arg3: memref<8x128xf32, #tpu.memory_space<vmem>>, %arg4: memref<8x128xf32, #tpu.memory_space<vmem>>, %arg5: memref<16x512xbf16, #tpu.memory_space<vmem>>, %arg6: memref<128x512xbf16, #tpu.memory_space<vmem>>, %arg7: memref<1x512xf32, #tpu.memory_space<vmem>>, %arg8: memref<4x8x128xbf16, #tpu.memory_space<vmem>>, %arg9: memref<8x128xf32, #tpu.memory_space<vmem>>, %arg10: memref<8x128xf32, #tpu.memory_space<vmem>>, %arg11: memref<8x128xf32, #tpu.memory_space<vmem>>, %arg12: memref<8x128xf32, #tpu.memory_space<vmem>>, %arg13: memref<4x8x512xf32, #tpu.memory_space<vmem>>, %arg14: memref<4x8x128xf32, #tpu.memory_space<vmem>>) attributes {dimension_semantics = [#tpu.dimension_semantics<parallel>, #tpu.dimension_semantics<arbitrary>], iteration_bounds = array<i64: 1, 3>, scalar_prefetch = 0 : i64, scratch_operands = 4 : i64, tpu.core_type = #tpu.core_type<tc>, window_params = [{transform_indices = @transform_0, window_bounds = array<i64: 4, 8, 16>}, {transform_indices = @transform_1, window_bounds = array<i64: 8, 128>}, {transform_indices = @transform_2, window_bounds = array<i64: 8, 128>}, {pipeline_mode = #tpu.pipeline_mode<synchronous>, transform_indices = @transform_3, window_bounds = array<i64: 16, 512>}, {pipeline_mode = #tpu.pipeline_mode<synchronous>, transform_indices = @transform_4, window_bounds = array<i64: 128, 512>}, {pipeline_mode = #tpu.pipeline_mode<synchronous>, transform_indices = @transform_5, window_bounds = array<i64: 1, 512>}, {transform_indices = @transform_6, window_bounds = array<i64: 4, 8, 128>}, {transform_indices = @transform_7, window_bounds = array<i64: 8, 128>}, {transform_indices = @transform_8, window_bounds = array<i64: 8, 128>}]} {
    %c0_i32 = arith.constant 0 : i32
    %0 = arith.cmpi eq, %arg1, %c0_i32 : i32
    %1 = arith.extui %0 : i1 to i32
    %c0_i32_0 = arith.constant 0 : i32
    %2 = arith.cmpi ne, %1, %c0_i32_0 : i32
    scf.if %2 {
      %c0_108 = arith.constant 0 : index
      %c0_109 = arith.constant 0 : index
      %257 = vector.load %arg3[%c0_108, %c0_109] : memref<8x128xf32, #tpu.memory_space<vmem>>, vector<8x128xf32>
      %c0_110 = arith.constant 0 : index
      %c0_111 = arith.constant 0 : index
      %258 = vector.load %arg11[%c0_110, %c0_111] : memref<8x128xf32, #tpu.memory_space<vmem>>, vector<8x128xf32>
      tpu.vector_store %arg11[%c0_110, %c0_111], %257 {strides = array<i32>} : memref<8x128xf32, #tpu.memory_space<vmem>>, vector<8x128xf32>,
      %c0_112 = arith.constant 0 : index
      %c0_113 = arith.constant 0 : index
      %259 = vector.load %arg4[%c0_112, %c0_113] : memref<8x128xf32, #tpu.memory_space<vmem>>, vector<8x128xf32>
      %c0_114 = arith.constant 0 : index
      %c0_115 = arith.constant 0 : index
      %260 = vector.load %arg12[%c0_114, %c0_115] : memref<8x128xf32, #tpu.memory_space<vmem>>, vector<8x128xf32>
      tpu.vector_store %arg12[%c0_114, %c0_115], %259 {strides = array<i32>} : memref<8x128xf32, #tpu.memory_space<vmem>>, vector<8x128xf32>,
    } else {
    }
    %c0 = arith.constant 0 : index
    %c0_1 = arith.constant 0 : index
    %c0_2 = arith.constant 0 : index
    %3 = vector.load %arg2[%c0, %c0_1, %c0_2] : memref<4x8x16xbf16, #tpu.memory_space<vmem>>, vector<4x8x16xbf16>
    %4 = vector.shape_cast %3 : vector<4x8x16xbf16> to vector<32x16xbf16>
    %c0_3 = arith.constant 0 : index
    %c0_4 = arith.constant 0 : index
    %5 = vector.load %arg5[%c0_3, %c0_4] : memref<16x512xbf16, #tpu.memory_space<vmem>>, vector<16x512xbf16>
    %cst = arith.constant dense<0.000000e+00> : vector<32x512xf32>
    %6 = tpu.matmul %4, %5, %cst {dimension_numbers = #tpu.dot_dimension_numbers<[1], [0], [0], [1], [0, 0, 1, 1], [], []>} : vector<32x16xbf16>, vector<16x512xbf16>, vector<32x512xf32> -> vector<32x512xf32>
    %c0_5 = arith.constant 0 : index
    %c0_6 = arith.constant 0 : index
    %7 = vector.load %arg7[%c0_5, %c0_6] : memref<1x512xf32, #tpu.memory_space<vmem>>, vector<1x512xf32>
    %8 = vector.broadcast %7 : vector<1x512xf32> to vector<32x512xf32>
    %9 = arith.addf %6, %8 : vector<32x512xf32>
    %10 = vector.shape_cast %9 : vector<32x512xf32> to vector<4x8x512xf32>
    %c0_7 = arith.constant 0 : index
    %c0_8 = arith.constant 0 : index
    %c0_9 = arith.constant 0 : index
    %11 = vector.load %arg13[%c0_7, %c0_8, %c0_9] : memref<4x8x512xf32, #tpu.memory_space<vmem>>, vector<4x8x512xf32>
    tpu.vector_store %arg13[%c0_7, %c0_8, %c0_9], %10 {strides = array<i32>} : memref<4x8x512xf32, #tpu.memory_space<vmem>>, vector<4x8x512xf32>,
    %c0_10 = arith.constant 0 : index
    %c0_11 = arith.constant 0 : index
    %12 = vector.load %arg11[%c0_10, %c0_11] : memref<8x128xf32, #tpu.memory_space<vmem>>, vector<8x128xf32>
    %c0_12 = arith.constant 0 : index
    %c0_13 = arith.constant 0 : index
    %13 = vector.load %arg12[%c0_12, %c0_13] : memref<8x128xf32, #tpu.memory_space<vmem>>, vector<8x128xf32>
    %c0_i32_14 = arith.constant 0 : i32
    %14 = arith.index_cast %c0_i32_14 : i32 to index
    %c0_15 = arith.constant 0 : index
    %c0_16 = arith.constant 0 : index
    %15 = vector.load %arg13[%14, %c0_15, %c0_16] : memref<4x8x512xf32, #tpu.memory_space<vmem>>, vector<1x8x512xf32>
    %16 = vector.shape_cast %15 : vector<1x8x512xf32> to vector<8x512xf32>
    %17 = arith.truncf %12 : vector<8x128xf32> to vector<8x128xbf16>
    %c0_17 = arith.constant 0 : index
    %c0_18 = arith.constant 0 : index
    %18 = vector.load %arg6[%c0_17, %c0_18] : memref<128x512xbf16, #tpu.memory_space<vmem>>, vector<128x512xbf16>
    %cst_19 = arith.constant dense<0.000000e+00> : vector<8x512xf32>
    %19 = tpu.matmul %17, %18, %cst_19 {dimension_numbers = #tpu.dot_dimension_numbers<[1], [0], [0], [1], [0, 0, 1, 1], [], []>} : vector<8x128xbf16>, vector<128x512xbf16>, vector<8x512xf32> -> vector<8x512xf32>
    %20 = arith.addf %16, %19 : vector<8x512xf32>
    %21 = vector.extract_strided_slice %20 {offsets = [0, 0], sizes = [8, 128], strides = [1, 1]} : vector<8x512xf32> to vector<8x128xf32>
    %cst_20 = arith.constant 5.000000e-01 : f32
    %22 = vector.broadcast %cst_20 : f32 to vector<8x128xf32>
    %23 = arith.mulf %22, %21 : vector<8x128xf32>
    %24 = math.tanh %23 : vector<8x128xf32>
    %cst_21 = arith.constant 1.000000e+00 : f32
    %25 = vector.broadcast %cst_21 : f32 to vector<8x128xf32>
    %26 = arith.addf %24, %25 : vector<8x128xf32>
    %cst_22 = arith.constant 5.000000e-01 : f32
    %27 = vector.broadcast %cst_22 : f32 to vector<8x128xf32>
    %28 = arith.mulf %27, %26 : vector<8x128xf32>
    %29 = vector.extract_strided_slice %20 {offsets = [0, 128], sizes = [8, 128], strides = [1, 1]} : vector<8x512xf32> to vector<8x128xf32>
    %cst_23 = arith.constant 5.000000e-01 : f32
    %30 = vector.broadcast %cst_23 : f32 to vector<8x128xf32>
    %31 = arith.mulf %30, %29 : vector<8x128xf32>
    %32 = math.tanh %31 : vector<8x128xf32>
    %cst_24 = arith.constant 1.000000e+00 : f32
    %33 = vector.broadcast %cst_24 : f32 to vector<8x128xf32>
    %34 = arith.addf %32, %33 : vector<8x128xf32>
    %cst_25 = arith.constant 5.000000e-01 : f32
    %35 = vector.broadcast %cst_25 : f32 to vector<8x128xf32>
    %36 = arith.mulf %35, %34 : vector<8x128xf32>
    %37 = vector.extract_strided_slice %20 {offsets = [0, 256], sizes = [8, 128], strides = [1, 1]} : vector<8x512xf32> to vector<8x128xf32>
    %38 = math.tanh %37 : vector<8x128xf32>
    %39 = vector.extract_strided_slice %20 {offsets = [0, 384], sizes = [8, 128], strides = [1, 1]} : vector<8x512xf32> to vector<8x128xf32>
    %cst_26 = arith.constant 5.000000e-01 : f32
    %40 = vector.broadcast %cst_26 : f32 to vector<8x128xf32>
    %41 = arith.mulf %40, %39 : vector<8x128xf32>
    %42 = math.tanh %41 : vector<8x128xf32>
    %cst_27 = arith.constant 1.000000e+00 : f32
    %43 = vector.broadcast %cst_27 : f32 to vector<8x128xf32>
    %44 = arith.addf %42, %43 : vector<8x128xf32>
    %cst_28 = arith.constant 5.000000e-01 : f32
    %45 = vector.broadcast %cst_28 : f32 to vector<8x128xf32>
    %46 = arith.mulf %45, %44 : vector<8x128xf32>
    %47 = arith.mulf %36, %13 : vector<8x128xf32>
    %48 = arith.mulf %28, %38 : vector<8x128xf32>
    %49 = arith.addf %47, %48 : vector<8x128xf32>
    %50 = math.tanh %49 : vector<8x128xf32>
    %51 = arith.mulf %46, %50 : vector<8x128xf32>
    %c4_i32 = arith.constant 4 : i32
    %52 = arith.muli %arg1, %c4_i32 : i32
    %53 = arith.addi %52, %c0_i32_14 : i32
    %c10_i32 = arith.constant 10 : i32
    %54 = arith.cmpi slt, %53, %c10_i32 : i32
    %55 = arith.extui %54 : i1 to i32
    %56 = arith.sitofp %55 : i32 to f32
    %57 = vector.broadcast %56 : f32 to vector<8x128xf32>
    %58 = arith.mulf %57, %51 : vector<8x128xf32>
    %cst_29 = arith.constant 1.000000e+00 : f32
    %59 = arith.subf %cst_29, %56 : f32
    %60 = vector.broadcast %59 : f32 to vector<8x128xf32>
    %61 = arith.mulf %60, %12 : vector<8x128xf32>
    %62 = arith.addf %58, %61 : vector<8x128xf32>
    %63 = vector.broadcast %56 : f32 to vector<8x128xf32>
    %64 = arith.mulf %63, %49 : vector<8x128xf32>
    %cst_30 = arith.constant 1.000000e+00 : f32
    %65 = arith.subf %cst_30, %56 : f32
    %66 = vector.broadcast %65 : f32 to vector<8x128xf32>
    %67 = arith.mulf %66, %13 : vector<8x128xf32>
    %68 = arith.addf %64, %67 : vector<8x128xf32>
    %69 = arith.index_cast %c0_i32_14 : i32 to index
    %c0_31 = arith.constant 0 : index
    %c0_32 = arith.constant 0 : index
    %70 = vector.load %arg14[%69, %c0_31, %c0_32] : memref<4x8x128xf32, #tpu.memory_space<vmem>>, vector<1x8x128xf32>
    %71 = vector.shape_cast %70 : vector<1x8x128xf32> to vector<8x128xf32>
    %72 = vector.shape_cast %62 : vector<8x128xf32> to vector<1x8x128xf32>
    tpu.vector_store %arg14[%69, %c0_31, %c0_32], %72 {strides = array<i32>} : memref<4x8x128xf32, #tpu.memory_space<vmem>>, vector<1x8x128xf32>,
    %c1_i32 = arith.constant 1 : i32
    %73 = arith.index_cast %c1_i32 : i32 to index
    %c0_33 = arith.constant 0 : index
    %c0_34 = arith.constant 0 : index
    %74 = vector.load %arg13[%73, %c0_33, %c0_34] : memref<4x8x512xf32, #tpu.memory_space<vmem>>, vector<1x8x512xf32>
    %75 = vector.shape_cast %74 : vector<1x8x512xf32> to vector<8x512xf32>
    %76 = arith.truncf %62 : vector<8x128xf32> to vector<8x128xbf16>
    %c0_35 = arith.constant 0 : index
    %c0_36 = arith.constant 0 : index
    %77 = vector.load %arg6[%c0_35, %c0_36] : memref<128x512xbf16, #tpu.memory_space<vmem>>, vector<128x512xbf16>
    %cst_37 = arith.constant dense<0.000000e+00> : vector<8x512xf32>
    %78 = tpu.matmul %76, %77, %cst_37 {dimension_numbers = #tpu.dot_dimension_numbers<[1], [0], [0], [1], [0, 0, 1, 1], [], []>} : vector<8x128xbf16>, vector<128x512xbf16>, vector<8x512xf32> -> vector<8x512xf32>
    %79 = arith.addf %75, %78 : vector<8x512xf32>
    %80 = vector.extract_strided_slice %79 {offsets = [0, 0], sizes = [8, 128], strides = [1, 1]} : vector<8x512xf32> to vector<8x128xf32>
    %cst_38 = arith.constant 5.000000e-01 : f32
    %81 = vector.broadcast %cst_38 : f32 to vector<8x128xf32>
    %82 = arith.mulf %81, %80 : vector<8x128xf32>
    %83 = math.tanh %82 : vector<8x128xf32>
    %cst_39 = arith.constant 1.000000e+00 : f32
    %84 = vector.broadcast %cst_39 : f32 to vector<8x128xf32>
    %85 = arith.addf %83, %84 : vector<8x128xf32>
    %cst_40 = arith.constant 5.000000e-01 : f32
    %86 = vector.broadcast %cst_40 : f32 to vector<8x128xf32>
    %87 = arith.mulf %86, %85 : vector<8x128xf32>
    %88 = vector.extract_strided_slice %79 {offsets = [0, 128], sizes = [8, 128], strides = [1, 1]} : vector<8x512xf32> to vector<8x128xf32>
    %cst_41 = arith.constant 5.000000e-01 : f32
    %89 = vector.broadcast %cst_41 : f32 to vector<8x128xf32>
    %90 = arith.mulf %89, %88 : vector<8x128xf32>
    %91 = math.tanh %90 : vector<8x128xf32>
    %cst_42 = arith.constant 1.000000e+00 : f32
    %92 = vector.broadcast %cst_42 : f32 to vector<8x128xf32>
    %93 = arith.addf %91, %92 : vector<8x128xf32>
    %cst_43 = arith.constant 5.000000e-01 : f32
    %94 = vector.broadcast %cst_43 : f32 to vector<8x128xf32>
    %95 = arith.mulf %94, %93 : vector<8x128xf32>
    %96 = vector.extract_strided_slice %79 {offsets = [0, 256], sizes = [8, 128], strides = [1, 1]} : vector<8x512xf32> to vector<8x128xf32>
    %97 = math.tanh %96 : vector<8x128xf32>
    %98 = vector.extract_strided_slice %79 {offsets = [0, 384], sizes = [8, 128], strides = [1, 1]} : vector<8x512xf32> to vector<8x128xf32>
    %cst_44 = arith.constant 5.000000e-01 : f32
    %99 = vector.broadcast %cst_44 : f32 to vector<8x128xf32>
    %100 = arith.mulf %99, %98 : vector<8x128xf32>
    %101 = math.tanh %100 : vector<8x128xf32>
    %cst_45 = arith.constant 1.000000e+00 : f32
    %102 = vector.broadcast %cst_45 : f32 to vector<8x128xf32>
    %103 = arith.addf %101, %102 : vector<8x128xf32>
    %cst_46 = arith.constant 5.000000e-01 : f32
    %104 = vector.broadcast %cst_46 : f32 to vector<8x128xf32>
    %105 = arith.mulf %104, %103 : vector<8x128xf32>
    %106 = arith.mulf %95, %68 : vector<8x128xf32>
    %107 = arith.mulf %87, %97 : vector<8x128xf32>
    %108 = arith.addf %106, %107 : vector<8x128xf32>
    %109 = math.tanh %108 : vector<8x128xf32>
    %110 = arith.mulf %105, %109 : vector<8x128xf32>
    %c4_i32_47 = arith.constant 4 : i32
    %111 = arith.muli %arg1, %c4_i32_47 : i32
    %112 = arith.addi %111, %c1_i32 : i32
    %c10_i32_48 = arith.constant 10 : i32
    %113 = arith.cmpi slt, %112, %c10_i32_48 : i32
    %114 = arith.extui %113 : i1 to i32
    %115 = arith.sitofp %114 : i32 to f32
    %116 = vector.broadcast %115 : f32 to vector<8x128xf32>
    %117 = arith.mulf %116, %110 : vector<8x128xf32>
    %cst_49 = arith.constant 1.000000e+00 : f32
    %118 = arith.subf %cst_49, %115 : f32
    %119 = vector.broadcast %118 : f32 to vector<8x128xf32>
    %120 = arith.mulf %119, %62 : vector<8x128xf32>
    %121 = arith.addf %117, %120 : vector<8x128xf32>
    %122 = vector.broadcast %115 : f32 to vector<8x128xf32>
    %123 = arith.mulf %122, %108 : vector<8x128xf32>
    %cst_50 = arith.constant 1.000000e+00 : f32
    %124 = arith.subf %cst_50, %115 : f32
    %125 = vector.broadcast %124 : f32 to vector<8x128xf32>
    %126 = arith.mulf %125, %68 : vector<8x128xf32>
    %127 = arith.addf %123, %126 : vector<8x128xf32>
    %128 = arith.index_cast %c1_i32 : i32 to index
    %c0_51 = arith.constant 0 : index
    %c0_52 = arith.constant 0 : index
    %129 = vector.load %arg14[%128, %c0_51, %c0_52] : memref<4x8x128xf32, #tpu.memory_space<vmem>>, vector<1x8x128xf32>
    %130 = vector.shape_cast %129 : vector<1x8x128xf32> to vector<8x128xf32>
    %131 = vector.shape_cast %121 : vector<8x128xf32> to vector<1x8x128xf32>
    tpu.vector_store %arg14[%128, %c0_51, %c0_52], %131 {strides = array<i32>} : memref<4x8x128xf32, #tpu.memory_space<vmem>>, vector<1x8x128xf32>,
    %c2_i32 = arith.constant 2 : i32
    %132 = arith.index_cast %c2_i32 : i32 to index
    %c0_53 = arith.constant 0 : index
    %c0_54 = arith.constant 0 : index
    %133 = vector.load %arg13[%132, %c0_53, %c0_54] : memref<4x8x512xf32, #tpu.memory_space<vmem>>, vector<1x8x512xf32>
    %134 = vector.shape_cast %133 : vector<1x8x512xf32> to vector<8x512xf32>
    %135 = arith.truncf %121 : vector<8x128xf32> to vector<8x128xbf16>
    %c0_55 = arith.constant 0 : index
    %c0_56 = arith.constant 0 : index
    %136 = vector.load %arg6[%c0_55, %c0_56] : memref<128x512xbf16, #tpu.memory_space<vmem>>, vector<128x512xbf16>
    %cst_57 = arith.constant dense<0.000000e+00> : vector<8x512xf32>
    %137 = tpu.matmul %135, %136, %cst_57 {dimension_numbers = #tpu.dot_dimension_numbers<[1], [0], [0], [1], [0, 0, 1, 1], [], []>} : vector<8x128xbf16>, vector<128x512xbf16>, vector<8x512xf32> -> vector<8x512xf32>
    %138 = arith.addf %134, %137 : vector<8x512xf32>
    %139 = vector.extract_strided_slice %138 {offsets = [0, 0], sizes = [8, 128], strides = [1, 1]} : vector<8x512xf32> to vector<8x128xf32>
    %cst_58 = arith.constant 5.000000e-01 : f32
    %140 = vector.broadcast %cst_58 : f32 to vector<8x128xf32>
    %141 = arith.mulf %140, %139 : vector<8x128xf32>
    %142 = math.tanh %141 : vector<8x128xf32>
    %cst_59 = arith.constant 1.000000e+00 : f32
    %143 = vector.broadcast %cst_59 : f32 to vector<8x128xf32>
    %144 = arith.addf %142, %143 : vector<8x128xf32>
    %cst_60 = arith.constant 5.000000e-01 : f32
    %145 = vector.broadcast %cst_60 : f32 to vector<8x128xf32>
    %146 = arith.mulf %145, %144 : vector<8x128xf32>
    %147 = vector.extract_strided_slice %138 {offsets = [0, 128], sizes = [8, 128], strides = [1, 1]} : vector<8x512xf32> to vector<8x128xf32>
    %cst_61 = arith.constant 5.000000e-01 : f32
    %148 = vector.broadcast %cst_61 : f32 to vector<8x128xf32>
    %149 = arith.mulf %148, %147 : vector<8x128xf32>
    %150 = math.tanh %149 : vector<8x128xf32>
    %cst_62 = arith.constant 1.000000e+00 : f32
    %151 = vector.broadcast %cst_62 : f32 to vector<8x128xf32>
    %152 = arith.addf %150, %151 : vector<8x128xf32>
    %cst_63 = arith.constant 5.000000e-01 : f32
    %153 = vector.broadcast %cst_63 : f32 to vector<8x128xf32>
    %154 = arith.mulf %153, %152 : vector<8x128xf32>
    %155 = vector.extract_strided_slice %138 {offsets = [0, 256], sizes = [8, 128], strides = [1, 1]} : vector<8x512xf32> to vector<8x128xf32>
    %156 = math.tanh %155 : vector<8x128xf32>
    %157 = vector.extract_strided_slice %138 {offsets = [0, 384], sizes = [8, 128], strides = [1, 1]} : vector<8x512xf32> to vector<8x128xf32>
    %cst_64 = arith.constant 5.000000e-01 : f32
    %158 = vector.broadcast %cst_64 : f32 to vector<8x128xf32>
    %159 = arith.mulf %158, %157 : vector<8x128xf32>
    %160 = math.tanh %159 : vector<8x128xf32>
    %cst_65 = arith.constant 1.000000e+00 : f32
    %161 = vector.broadcast %cst_65 : f32 to vector<8x128xf32>
    %162 = arith.addf %160, %161 : vector<8x128xf32>
    %cst_66 = arith.constant 5.000000e-01 : f32
    %163 = vector.broadcast %cst_66 : f32 to vector<8x128xf32>
    %164 = arith.mulf %163, %162 : vector<8x128xf32>
    %165 = arith.mulf %154, %127 : vector<8x128xf32>
    %166 = arith.mulf %146, %156 : vector<8x128xf32>
    %167 = arith.addf %165, %166 : vector<8x128xf32>
    %168 = math.tanh %167 : vector<8x128xf32>
    %169 = arith.mulf %164, %168 : vector<8x128xf32>
    %c4_i32_67 = arith.constant 4 : i32
    %170 = arith.muli %arg1, %c4_i32_67 : i32
    %171 = arith.addi %170, %c2_i32 : i32
    %c10_i32_68 = arith.constant 10 : i32
    %172 = arith.cmpi slt, %171, %c10_i32_68 : i32
    %173 = arith.extui %172 : i1 to i32
    %174 = arith.sitofp %173 : i32 to f32
    %175 = vector.broadcast %174 : f32 to vector<8x128xf32>
    %176 = arith.mulf %175, %169 : vector<8x128xf32>
    %cst_69 = arith.constant 1.000000e+00 : f32
    %177 = arith.subf %cst_69, %174 : f32
    %178 = vector.broadcast %177 : f32 to vector<8x128xf32>
    %179 = arith.mulf %178, %121 : vector<8x128xf32>
    %180 = arith.addf %176, %179 : vector<8x128xf32>
    %181 = vector.broadcast %174 : f32 to vector<8x128xf32>
    %182 = arith.mulf %181, %167 : vector<8x128xf32>
    %cst_70 = arith.constant 1.000000e+00 : f32
    %183 = arith.subf %cst_70, %174 : f32
    %184 = vector.broadcast %183 : f32 to vector<8x128xf32>
    %185 = arith.mulf %184, %127 : vector<8x128xf32>
    %186 = arith.addf %182, %185 : vector<8x128xf32>
    %187 = arith.index_cast %c2_i32 : i32 to index
    %c0_71 = arith.constant 0 : index
    %c0_72 = arith.constant 0 : index
    %188 = vector.load %arg14[%187, %c0_71, %c0_72] : memref<4x8x128xf32, #tpu.memory_space<vmem>>, vector<1x8x128xf32>
    %189 = vector.shape_cast %188 : vector<1x8x128xf32> to vector<8x128xf32>
    %190 = vector.shape_cast %180 : vector<8x128xf32> to vector<1x8x128xf32>
    tpu.vector_store %arg14[%187, %c0_71, %c0_72], %190 {strides = array<i32>} : memref<4x8x128xf32, #tpu.memory_space<vmem>>, vector<1x8x128xf32>,
    %c3_i32 = arith.constant 3 : i32
    %191 = arith.index_cast %c3_i32 : i32 to index
    %c0_73 = arith.constant 0 : index
    %c0_74 = arith.constant 0 : index
    %192 = vector.load %arg13[%191, %c0_73, %c0_74] : memref<4x8x512xf32, #tpu.memory_space<vmem>>, vector<1x8x512xf32>
    %193 = vector.shape_cast %192 : vector<1x8x512xf32> to vector<8x512xf32>
    %194 = arith.truncf %180 : vector<8x128xf32> to vector<8x128xbf16>
    %c0_75 = arith.constant 0 : index
    %c0_76 = arith.constant 0 : index
    %195 = vector.load %arg6[%c0_75, %c0_76] : memref<128x512xbf16, #tpu.memory_space<vmem>>, vector<128x512xbf16>
    %cst_77 = arith.constant dense<0.000000e+00> : vector<8x512xf32>
    %196 = tpu.matmul %194, %195, %cst_77 {dimension_numbers = #tpu.dot_dimension_numbers<[1], [0], [0], [1], [0, 0, 1, 1], [], []>} : vector<8x128xbf16>, vector<128x512xbf16>, vector<8x512xf32> -> vector<8x512xf32>
    %197 = arith.addf %193, %196 : vector<8x512xf32>
    %198 = vector.extract_strided_slice %197 {offsets = [0, 0], sizes = [8, 128], strides = [1, 1]} : vector<8x512xf32> to vector<8x128xf32>
    %cst_78 = arith.constant 5.000000e-01 : f32
    %199 = vector.broadcast %cst_78 : f32 to vector<8x128xf32>
    %200 = arith.mulf %199, %198 : vector<8x128xf32>
    %201 = math.tanh %200 : vector<8x128xf32>
    %cst_79 = arith.constant 1.000000e+00 : f32
    %202 = vector.broadcast %cst_79 : f32 to vector<8x128xf32>
    %203 = arith.addf %201, %202 : vector<8x128xf32>
    %cst_80 = arith.constant 5.000000e-01 : f32
    %204 = vector.broadcast %cst_80 : f32 to vector<8x128xf32>
    %205 = arith.mulf %204, %203 : vector<8x128xf32>
    %206 = vector.extract_strided_slice %197 {offsets = [0, 128], sizes = [8, 128], strides = [1, 1]} : vector<8x512xf32> to vector<8x128xf32>
    %cst_81 = arith.constant 5.000000e-01 : f32
    %207 = vector.broadcast %cst_81 : f32 to vector<8x128xf32>
    %208 = arith.mulf %207, %206 : vector<8x128xf32>
    %209 = math.tanh %208 : vector<8x128xf32>
    %cst_82 = arith.constant 1.000000e+00 : f32
    %210 = vector.broadcast %cst_82 : f32 to vector<8x128xf32>
    %211 = arith.addf %209, %210 : vector<8x128xf32>
    %cst_83 = arith.constant 5.000000e-01 : f32
    %212 = vector.broadcast %cst_83 : f32 to vector<8x128xf32>
    %213 = arith.mulf %212, %211 : vector<8x128xf32>
    %214 = vector.extract_strided_slice %197 {offsets = [0, 256], sizes = [8, 128], strides = [1, 1]} : vector<8x512xf32> to vector<8x128xf32>
    %215 = math.tanh %214 : vector<8x128xf32>
    %216 = vector.extract_strided_slice %197 {offsets = [0, 384], sizes = [8, 128], strides = [1, 1]} : vector<8x512xf32> to vector<8x128xf32>
    %cst_84 = arith.constant 5.000000e-01 : f32
    %217 = vector.broadcast %cst_84 : f32 to vector<8x128xf32>
    %218 = arith.mulf %217, %216 : vector<8x128xf32>
    %219 = math.tanh %218 : vector<8x128xf32>
    %cst_85 = arith.constant 1.000000e+00 : f32
    %220 = vector.broadcast %cst_85 : f32 to vector<8x128xf32>
    %221 = arith.addf %219, %220 : vector<8x128xf32>
    %cst_86 = arith.constant 5.000000e-01 : f32
    %222 = vector.broadcast %cst_86 : f32 to vector<8x128xf32>
    %223 = arith.mulf %222, %221 : vector<8x128xf32>
    %224 = arith.mulf %213, %186 : vector<8x128xf32>
    %225 = arith.mulf %205, %215 : vector<8x128xf32>
    %226 = arith.addf %224, %225 : vector<8x128xf32>
    %227 = math.tanh %226 : vector<8x128xf32>
    %228 = arith.mulf %223, %227 : vector<8x128xf32>
    %c4_i32_87 = arith.constant 4 : i32
    %229 = arith.muli %arg1, %c4_i32_87 : i32
    %230 = arith.addi %229, %c3_i32 : i32
    %c10_i32_88 = arith.constant 10 : i32
    %231 = arith.cmpi slt, %230, %c10_i32_88 : i32
    %232 = arith.extui %231 : i1 to i32
    %233 = arith.sitofp %232 : i32 to f32
    %234 = vector.broadcast %233 : f32 to vector<8x128xf32>
    %235 = arith.mulf %234, %228 : vector<8x128xf32>
    %cst_89 = arith.constant 1.000000e+00 : f32
    %236 = arith.subf %cst_89, %233 : f32
    %237 = vector.broadcast %236 : f32 to vector<8x128xf32>
    %238 = arith.mulf %237, %180 : vector<8x128xf32>
    %239 = arith.addf %235, %238 : vector<8x128xf32>
    %240 = vector.broadcast %233 : f32 to vector<8x128xf32>
    %241 = arith.mulf %240, %226 : vector<8x128xf32>
    %cst_90 = arith.constant 1.000000e+00 : f32
    %242 = arith.subf %cst_90, %233 : f32
    %243 = vector.broadcast %242 : f32 to vector<8x128xf32>
    %244 = arith.mulf %243, %186 : vector<8x128xf32>
    %245 = arith.addf %241, %244 : vector<8x128xf32>
    %246 = arith.index_cast %c3_i32 : i32 to index
    %c0_91 = arith.constant 0 : index
    %c0_92 = arith.constant 0 : index
    %247 = vector.load %arg14[%246, %c0_91, %c0_92] : memref<4x8x128xf32, #tpu.memory_space<vmem>>, vector<1x8x128xf32>
    %248 = vector.shape_cast %247 : vector<1x8x128xf32> to vector<8x128xf32>
    %249 = vector.shape_cast %239 : vector<8x128xf32> to vector<1x8x128xf32>
    tpu.vector_store %arg14[%246, %c0_91, %c0_92], %249 {strides = array<i32>} : memref<4x8x128xf32, #tpu.memory_space<vmem>>, vector<1x8x128xf32>,
    %c4_i32_93 = arith.constant 4 : i32
    %c0_94 = arith.constant 0 : index
    %c0_95 = arith.constant 0 : index
    %250 = vector.load %arg11[%c0_94, %c0_95] : memref<8x128xf32, #tpu.memory_space<vmem>>, vector<8x128xf32>
    tpu.vector_store %arg11[%c0_94, %c0_95], %239 {strides = array<i32>} : memref<8x128xf32, #tpu.memory_space<vmem>>, vector<8x128xf32>,
    %c0_96 = arith.constant 0 : index
    %c0_97 = arith.constant 0 : index
    %251 = vector.load %arg12[%c0_96, %c0_97] : memref<8x128xf32, #tpu.memory_space<vmem>>, vector<8x128xf32>
    tpu.vector_store %arg12[%c0_96, %c0_97], %245 {strides = array<i32>} : memref<8x128xf32, #tpu.memory_space<vmem>>, vector<8x128xf32>,
    %c0_98 = arith.constant 0 : index
    %c0_99 = arith.constant 0 : index
    %252 = vector.load %arg9[%c0_98, %c0_99] : memref<8x128xf32, #tpu.memory_space<vmem>>, vector<8x128xf32>
    tpu.vector_store %arg9[%c0_98, %c0_99], %239 {strides = array<i32>} : memref<8x128xf32, #tpu.memory_space<vmem>>, vector<8x128xf32>,
    %c0_100 = arith.constant 0 : index
    %c0_101 = arith.constant 0 : index
    %253 = vector.load %arg10[%c0_100, %c0_101] : memref<8x128xf32, #tpu.memory_space<vmem>>, vector<8x128xf32>
    tpu.vector_store %arg10[%c0_100, %c0_101], %245 {strides = array<i32>} : memref<8x128xf32, #tpu.memory_space<vmem>>, vector<8x128xf32>,
    %c0_102 = arith.constant 0 : index
    %c0_103 = arith.constant 0 : index
    %c0_104 = arith.constant 0 : index
    %254 = vector.load %arg14[%c0_102, %c0_103, %c0_104] : memref<4x8x128xf32, #tpu.memory_space<vmem>>, vector<4x8x128xf32>
    %255 = arith.truncf %254 : vector<4x8x128xf32> to vector<4x8x128xbf16>
    %c0_105 = arith.constant 0 : index
    %c0_106 = arith.constant 0 : index
    %c0_107 = arith.constant 0 : index
    %256 = vector.load %arg8[%c0_105, %c0_106, %c0_107] : memref<4x8x128xbf16, #tpu.memory_space<vmem>>, vector<4x8x128xbf16>
    tpu.vector_store %arg8[%c0_105, %c0_106, %c0_107], %255 {strides = array<i32>} : memref<4x8x128xbf16, #tpu.memory_space<vmem>>, vector<4x8x128xbf16>,
    return
  }
  func.func @transform_0(%arg0: i32, %arg1: i32) -> (i32, i32, i32) {
    %c0_i32 = arith.constant 0 : i32
    %c0_i32_0 = arith.constant 0 : i32
    return %arg1, %arg0, %c0_i32 : i32, i32, i32
  }
  func.func @transform_1(%arg0: i32, %arg1: i32) -> (i32, i32) {
    %c0_i32 = arith.constant 0 : i32
    %c0_i32_0 = arith.constant 0 : i32
    return %arg0, %c0_i32 : i32, i32
  }
  func.func @transform_2(%arg0: i32, %arg1: i32) -> (i32, i32) {
    %c0_i32 = arith.constant 0 : i32
    %c0_i32_0 = arith.constant 0 : i32
    return %arg0, %c0_i32 : i32, i32
  }
  func.func @transform_3(%arg0: i32, %arg1: i32) -> (i32, i32) {
    %c0_i32 = arith.constant 0 : i32
    %c0_i32_0 = arith.constant 0 : i32
    %c0_i32_1 = arith.constant 0 : i32
    return %c0_i32, %c0_i32_0 : i32, i32
  }
  func.func @transform_4(%arg0: i32, %arg1: i32) -> (i32, i32) {
    %c0_i32 = arith.constant 0 : i32
    %c0_i32_0 = arith.constant 0 : i32
    %c0_i32_1 = arith.constant 0 : i32
    return %c0_i32, %c0_i32_0 : i32, i32
  }
  func.func @transform_5(%arg0: i32, %arg1: i32) -> (i32, i32) {
    %c0_i32 = arith.constant 0 : i32
    %c0_i32_0 = arith.constant 0 : i32
    %c0_i32_1 = arith.constant 0 : i32
    return %c0_i32, %c0_i32_0 : i32, i32
  }
  func.func @transform_6(%arg0: i32, %arg1: i32) -> (i32, i32, i32) {
    %c0_i32 = arith.constant 0 : i32
    %c0_i32_0 = arith.constant 0 : i32
    return %arg1, %arg0, %c0_i32 : i32, i32, i32
  }
  func.func @transform_7(%arg0: i32, %arg1: i32) -> (i32, i32) {
    %c0_i32 = arith.constant 0 : i32
    %c0_i32_0 = arith.constant 0 : i32
    return %arg0, %c0_i32 : i32, i32
  }
  func.func @transform_8(%arg0: i32, %arg1: i32) -> (i32, i32) {
    %c0_i32 = arith.constant 0 : i32
    %c0_i32_0 = arith.constant 0 : i32
    return %arg0, %c0_i32 : i32, i32
  }
}

</mosaic_0001>

<bundles_post_ra>
// kernel: tpu_custom_call.1
= control target key start
LH: loop header
LB: loop body
LE: loop exit
PB: predicated region body
PF: predicated region fallthrough
CT: control target
= control target key end

     0   :  { %s3345_s0 = inlined_call_operand.hbm [shape: bf16[12,8,16], index: 0, kind: input, shape index: {}]   ;;  %s3346_s1 = inlined_call_operand.hbm [shape: f32[8,128], index: 1, kind: input, shape index: {}]   ;;  %s3347_s2 = inlined_call_operand.hbm [shape: f32[8,128], index: 2, kind: input, shape index: {}]   ;;  %s3348_s3 = inlined_call_operand.hbm [shape: bf16[16,512], index: 3, kind: input, shape index: {}]   ;;  %s3349_s4 = inlined_call_operand.hbm [shape: bf16[128,512], index: 4, kind: input, shape index: {}]   ;;  %s3350_s5 = inlined_call_operand.vmem [shape: f32[1,512], index: 5, kind: input, shape index: {}]   ;;  %s3351_s6 = inlined_call_operand.hbm [shape: bf16[12,8,128], index: 6, kind: output, shape index: {0}]   ;;  %s3352_s7 = inlined_call_operand.hbm [shape: f32[8,128], index: 7, kind: output, shape index: {1}]   ;;  %s3353_s8 = inlined_call_operand.hbm [shape: f32[8,128], index: 8, kind: output, shape index: {2}]  }
   0x1   :  { %3362 = sst [smem:[#allocation29_spill]] %s3346_s1 }
   0x2   :  { %3363 = sst [smem:[#allocation30_spill]] %s3347_s2 }
   0x3   :  { %3364 = sst [smem:[#allocation31_spill]] %s3348_s3 }
   0x4   :  { %3365 = sst [smem:[#allocation32_spill]] %s3349_s4 }
   0x5   :  { %14 = vsyncpa [#allocation7], 0 }
   0x6   :  { %16 = vsyncpa [#allocation7 + $0x1], 0 }
   0x7   :  { %17 = vsyncpa [#allocation10], 0 }
   0x8   :  { %18 = vsyncpa [#allocation13], 0 }
   0x9   :  { %19 = vsyncpa [#allocation8], 0 }
   0xa   :  { %21 = vsyncpa [#allocation8 + $0x1], 0 }
   0xb   :  { %22 = vsyncpa [#allocation17], 0  ;;  %s2826_s27 = smov 0   ;;  %s2828_s28 = smov 0  }
   0xc   :  { %s2830_s29 = smov 0   ;;  %s2832_s30 = smov 0  }
   0xd   :  { %s2834_s9 = smov 0   ;;  %s2836_s10 = smov 0  }
   0xe LB: > { %s2092_s11 = sadd.s32 4294967295, %s2764_s10   ;;  %s2093_s12 = sadd.s32 4294967294, %s2764_s10   ;;  %s2764_s10 = sphi %s2836_s10, %s28_s10   ;;  %s2760_s9 = sphi %s2834_s9, %s3399_s9   ;;  %s2756_s30 = sphi %s2832_s30, %s3398_s30   ;;  %s2752_s29 = sphi %s2830_s29, %s3397_s29   ;;  %s2748_s28 = sphi %s2828_s28, %s3396_s28   ;;  %s2744_s27 = sphi %s2826_s27, %s3395_s27  }
   0xf   : > { %p62_p0 = scmp.ne.s32.totalorder %s2748_s28, %s2744_s27  ;;  %p2860_p1 = scmp.eq.s32.totalorder %s2092_s11, 0 }
  0x10   : > { %p2864_p2 = scmp.eq.s32.totalorder %s2092_s11, 2  ;;  %p209_p3 = scmp.eq.s32.totalorder %s2093_s12, 2 }
  0x11   : > { %s3366_s13 = scalar_select %p2860_p1, 1, 0 }
  0x12   : > { %s3367_s14 = scalar_select %p2864_p2, 1, 0 }
  0x13   : > { %p2870_p4 = por %p2860_p1, %p62_p0  ;;  %p2094_p5 = scmp.ge.s32.totalorder %s2764_s10, 1 }
  0x14   : > { %p2875_p6 = por %p209_p3, %p62_p0  ;;  %p268_p7 = scmp.lt.s32.totalorder %s2764_s10, 4 }
  0x15   : > { %s3368_s15 = scalar_select %p2870_p4, 1, 0 }
  0x16   : > { %s3369_s16 = scalar_select %p2875_p6, 1, 0 }
  0x17   : > { %p2880_p8 = pnand %p2094_p5, %p268_p7  ;;  %s2766_s18 = smov [#allocation9]  }
  0x18   : > { %s283_s19 = sshll.u32 %s2766_s18, 4  ;;  %s2767_s20 = smov [#allocation12]   ;;  %s284_s19 = int_to_ptr.vmem [resolvable:$true] %s283_s19 }
  0x19   : > { %s3370_s17 = scalar_select %p2880_p8, 1, 0 }
  0x1a   : > { %p2300_p9 = pneg %p2880_p8  ;;  %s306_s21 = sshll.u32 %s2767_s20, 4  ;;  %s307_s21 = int_to_ptr.vmem [resolvable:$true] %s306_s21 }
  0x1b   : > { %s2768_s23 = smov [#allocation11]   ;;  %s2503_s25 = scalar_lea.vmem %s284_s19, 128 }
  0x1c   : > { %p2888_p10 = pnand %p2300_p9, %p2860_p1  ;;  %s296_s24 = sshll.u32 %s2768_s23, 4  ;;  %s297_s24 = int_to_ptr.vmem [resolvable:$true] %s296_s24 }
  0x1d   : > { %p2504_p12 = scmp.ne.s32.totalorder %s284_s19, %s2503_s25  ;;  %p2511_p3 = scmp.lt.s32.totalorder %s284_s19, %s284_s19 }
  0x1e   : > { %p2494_p11 = pneg %p2888_p10  ;;  %p2512_p5 = scmp.lt.s32.totalorder %s2503_s25, %s2503_s25 }
  0x20   : > { %p2506_p13 = pnand %p2504_p12, %p2494_p11  ;;  %p2513_p7 = por %p2512_p5, %p2511_p3 }
  0x22   : > { %p2507_p0 = pneg %p2506_p13 }
  0x24   : > { %p2514_p9 = pnand %p2513_p7, %p2507_p0 }
  0x26   : > { %2517 = shalt.err (!%p2514_p9)
}
  0x27   : > { %s3372_s1 = sld [smem:[#allocation29_spill]]  ;;  %s2529_s12 = scalar_lea.vmem %s307_s21, 512 }
  0x28   : > { %p2530_p6 = scmp.ne.s32.totalorder %s307_s21, %s2529_s12  ;;  %p2537_p12 = scmp.lt.s32.totalorder %s307_s21, %s307_s21 }
  0x29   : > { %p2538_p13 = scmp.lt.s32.totalorder %s2529_s12, %s2529_s12 }
  0x2a   : > { %p2532_p1 = pnand %p2530_p6, %p2494_p11 }
  0x2b   : > { %p2539_p8 = por %p2538_p13, %p2537_p12 }
  0x2c   : > { %p2533_p4 = pneg %p2532_p1 }
  0x2d   : > { %2303 = dma.hbm_to_vmem [thread:$0]  (!%p2888_p10), %s3372_s1, 128, %s284_s19, [#allocation10]  }
  0x2e   : > { %p2540_p2 = pnand %p2539_p8, %p2533_p4 }
  0x30   : > { %2543 = shalt.err (!%p2540_p2)
}
  0x31   : > { %s2769_s18 = smov 256   ;;  %s2770_s20 = smov 16  }
  0x32   : > { %s3373_s3 = sld [smem:[#allocation31_spill]]  ;;  %s2555_s19 = scalar_lea.vmem %s297_s24, 128 }
  0x33   : > { %p2556_p0 = scmp.ne.s32.totalorder %s297_s24, %s2555_s19  ;;  %p2563_p3 = scmp.lt.s32.totalorder %s297_s24, %s297_s24 }
  0x34   : > { %p2564_p5 = scmp.lt.s32.totalorder %s2555_s19, %s2555_s19 }
  0x35   : > { %p2558_p1 = pnand %p2556_p0, %p2494_p11 }
  0x36   : > { %p2565_p4 = por %p2564_p5, %p2563_p3 }
  0x37   : > { %p2559_p6 = pneg %p2558_p1 }
  0x38   : > { %2309 = dma.hbm_to_vmem [thread:$0]  (!%p2888_p10), %s3373_s3, 512, %s307_s21, [#allocation13], %s2769_s18, %s2769_s18, %s2770_s20  }
  0x39   : > { %p2566_p2 = pnand %p2565_p4, %p2559_p6 }
  0x3b   : > { %2569 = shalt.err (!%p2566_p2)
}
  0x3c   : > { %s3374_s2 = sld [smem:[#allocation30_spill]]  ;;  %s2771_s21 = smov [#allocation14]  }
  0x3d   : > { %s319_s12 = sshll.u32 %s2771_s21, 4  ;;  %s320_s12 = int_to_ptr.vmem [resolvable:$true] %s319_s12 }
  0x3e   : > { %s2581_s23 = scalar_lea.vmem %s320_s12, 4096  ;;  %p2589_p12 = scmp.lt.s32.totalorder %s320_s12, %s320_s12 }
  0x3f   : > { %p2582_p8 = scmp.ne.s32.totalorder %s320_s12, %s2581_s23  ;;  %p2590_p13 = scmp.lt.s32.totalorder %s2581_s23, %s2581_s23 }
  0x41   : > { %p2584_p7 = pnand %p2582_p8, %p2494_p11  ;;  %p2591_p0 = por %p2590_p13, %p2589_p12 }
  0x42   : > { %2306 = dma.hbm_to_vmem [thread:$0]  (!%p2888_p10), %s3374_s2, 128, %s297_s24, [#allocation10]  }
  0x43   : > { %p2585_p9 = pneg %p2584_p7 }
  0x45   : > { %p2592_p1 = pnand %p2591_p0, %p2585_p9 }
  0x47   : > { %2595 = shalt.err (!%p2592_p1)
}
  0x48   : > { %s3375_s4 = sld [smem:[#allocation32_spill]]  ;;  %s37_s24 = sadd.s32 1, %s2760_s9 }
  0x49   : > { %s49_s26 = sadd.s32 1, %s2752_s29  ;;  %p38_p11 = scmp.ge.s32.totalorder %s37_s24, 3 }
  0x4a   : > { %p56_p6 = scmp.ne.s32.totalorder %s2752_s29, %s2748_s28  ;;  %p57_p3 = scmp.eq.s32.totalorder %s2764_s10, 0 }
  0x4b   : > { %p2325_p5 = scmp.lt.s32.totalorder %s2764_s10, 3  ;;  %s3401_s24 = smov (%p38_p11, %s37_s24), 0 }
  0x4c   : > { %3376 = sst [smem:[#allocation24_spill]] %s3401_s24  ;;  %p58_p4 = por %p57_p3, %p56_p6 }
  0x4d   : > { %p3377_p2 = scmp.ne.s32.totalorder %s3367_s14, 0  ;;  %s44_s11 = ssub.s32 %s2760_s9, %s3401_s24 }
  0x4e   : > { %2312 = dma.hbm_to_vmem [thread:$0]  (!%p2888_p10), %s3375_s4, 4096, %s320_s12, [#allocation13], %s2769_s18, %s2769_s18, %s2770_s20  }
  0x4f   : > { %p2936_p8 = por %p3377_p2, %p56_p6  ;;  %s336_s21 = sand.u32 1, %s2752_s29  }
  0x50   : > { %p47_p7 = scmp.eq.s32.totalorder %s44_s11, 0  ;;  %s2100_s18 = sshll.u32 %s336_s21, 4 }
  0x51   : > { %s2259_s20 = sshll.u32 %s2760_s9, 8  ;;  %s340_s1 = scalar_lea.vmem [#allocation6], %s2100_s18 }
  0x52   : > { %s2945_s12 = scalar_select %p47_p7, %s2752_s29, %s49_s26  }
  0x53   : > { %s347_s19 = scalar_lea.hbm %s3345_s0, %s2259_s20  ;;  %s348_s2 = sshll.u32 %s340_s1, 4  ;;  %s349_s2 = int_to_ptr.vmem [resolvable:$true] %s348_s2 }
  0x54   : > { %p2952_p10 = pnand %p2325_p5, %p58_p4  ;;  %s337_s4 = scalar_lea.sflag [#allocation7], %s336_s21 }
  0x55   : > { %s2609_s11 = scalar_lea.vmem %s349_s2, 256  ;;  %s2772_s26 = smov [#allocation6]  }
  0x56   : > { %p2598_p9 = pneg %p2952_p10  ;;  %p2610_p12 = scmp.ne.s32.totalorder %s349_s2, %s2609_s11 }
  0x57   : > { %s2614_s24 = sshll.u32 %s2772_s26, 4  ;;  %s2615_s24 = int_to_ptr.vmem [resolvable:$false] %s2614_s24 }
  0x58   : > { %p2612_p13 = pnand %p2610_p12, %p2598_p9  ;;  %s2616_s20 = scalar_lea.vmem %s2615_s24, 512 }
  0x59   : > { %p2617_p1 = scmp.lt.s32.totalorder %s349_s2, %s2615_s24  ;;  %p2618_p11 = scmp.lt.s32.totalorder %s2616_s20, %s2609_s11 }
  0x5a   : > { %p2613_p0 = pneg %p2612_p13 }
  0x5b   : > { %p2619_p6 = por %p2618_p11, %p2617_p1 }
  0x5d   : > { %p2620_p3 = pnand %p2619_p6, %p2613_p0 }
  0x5f   : > { %2623 = shalt.err (!%p2620_p3)
}
  0x60   : > { %s2773_s1 = smov 64   ;;  %s2774_s18 = smov 4  }
  0x61   : > { %2316 = dma.hbm_to_vmem [thread:$0]  (!%p2952_p10), %s347_s19, 256, %s349_s2, %s337_s4, %s2773_s1, %s2773_s1, %s2774_s18  }
  0x62   : > { %p3380_p5 = scmp.ne.s32.totalorder %s3370_s17, 0 }
  0x64   : > { %360 = sbr.rel (%p3380_p5) target bundleno = 1170 (0x492), region = 44 }
  0x69   : > { %s2963_s21 = sand.u32 1, %s2748_s28   ;;  %p3381_p4 = scmp.ne.s32.totalorder %s3368_s15, 0 }
  0x6a   : > { %s2104_s23 = sshll.u32 %s2963_s21, 4  ;;  %s363_s24 = scalar_lea.sflag [#allocation7], %s2963_s21 }
  0x6b   : > { %s2967_s25 = scalar_lea.vmem [#allocation6], %s2104_s23 }
  0x6c   : > { %2723 = dma.done.wait (%p3381_p4), %s363_s24, 256  }
  0x6d   : > { %2725 = vsyncadd (%p3381_p4), %s363_s24, 4294967040  ;;  %p3382_p2 = scmp.ne.s32.totalorder %s3366_s13, 0 }
  0x6f   : > { %2727 = dma.done.wait (%p3382_p2), [#allocation10], 256  }
  0x70   : > { %2729 = vsyncadd (%p3382_p2), [#allocation10], 4294967040 }
  0x71   : > { %2731 = dma.done.wait (%p3382_p2), [#allocation13], 4608  }
  0x72   : > { %2733 = vsyncadd (%p3382_p2), [#allocation13], 4294962688  ;;  %s2981_s2 = scalar_lea.vmem [#allocation15], %s2104_s23  ;;  %p2110_p7 = scmp.ne.s32.totalorder %s2756_s30, 0 }
  0x74   : > { %421 = sbr.rel (%p2110_p7) target bundleno = 123 (0x7b), region = 68 }
  0x79   : > { %v422_v0 = vld [vmem:[#allocation9] sm:$0xff]  ;;  %v424_v1 = vld [vmem:[#allocation11] sm:$0xff] }
  0x7a   : > { %423 = vst [vmem:[#allocation2] sm:$0xff] %v422_v0  ;;  %425 = vst [vmem:[#allocation3] sm:$0xff] %v424_v1 }
  0x7b PF: > { %v2396_v2 = vld [vmem:[#allocation12 + $0x4] ss:$16 sps:$4 sm:$0xff]   ;;  %v2398_v3 = vld [vmem:[#allocation12 + $0xc] ss:$16 sps:$4 sm:$0xff]   ;;  %v3360_v4 = vmov 0   ;;  %vm486_vm0 = vcmask 130048   ;;  %v436_v43 = vlaneseq }
  0x7c   : > { %525 = vmatprep.mubr.bf16.mxu0 %v3360_v4  ;;  %578 = vmatprep.mubr.bf16.mxu1 %v3360_v4  ;;  %v2400_v5 = vld [vmem:[#allocation12] ss:$16 sps:$4 sm:$0xff]   ;;  %v2401_v6 = vld [vmem:[#allocation12 + $0x8] ss:$16 sps:$4 sm:$0xff]   ;;  %v2989_v9 = vld [vmem:[#allocation14 + $0xe4] ss:$16 sps:$4 sm:$0xff]  }
  0x7d   : > { %507 = vmatprep.subr.bf16.mxu0 %v2396_v2  ;;  %560 = vmatprep.subr.bf16.mxu1 %v2398_v3  ;;  %v2402_v7 = vld [vmem:[%s2967_s25] sm:$0xff]   ;;  %v2991_v10 = vld [vmem:[#allocation14 + $0xe8] ss:$16 sps:$4 sm:$0xff]   ;;  %v2994_v11 = vld [vmem:[#allocation14 + $0xec] ss:$16 sps:$4 sm:$0xff]   ;;  %v437_v44 = vshrl.u32 %v436_v43, 7 }
  0x7e   : > { %508 = vmatpush1.bf16.msra.mxu0 %v2400_v5  ;;  %561 = vmatpush1.bf16.msra.mxu1 %v2401_v6  ;;  %v2987_v8 = vld [vmem:[#allocation14 + $0xe0] ss:$16 sps:$4 sm:$0xff]   ;;  %v2998_v12 = vld [vmem:[#allocation14 + $0xc4] ss:$16 sps:$4 sm:$0xff]   ;;  %v3004_v14 = vld [vmem:[#allocation14 + $0xcc] ss:$16 sps:$4 sm:$0xff]  }
  0x7f   : > { %814 = vmatprep.subr.bf16.mxu0 %v2989_v9  ;;  %855 = vmatprep.subr.bf16.mxu1 %v2994_v11  ;;  %v3002_v13 = vld [vmem:[#allocation14 + $0xc0] ss:$16 sps:$4 sm:$0xff]   ;;  %v3008_v15 = vld [vmem:[#allocation14 + $0xc8] ss:$16 sps:$4 sm:$0xff]   ;;  %v3011_v16 = vld [vmem:[#allocation14 + $0xa4] ss:$16 sps:$4 sm:$0xff]  }
  0x80   : > { %v3014_v17 = vld [vmem:[#allocation14 + $0xac] ss:$16 sps:$4 sm:$0xff]   ;;  %v3018_v18 = vld [vmem:[#allocation14 + $0xa0] ss:$16 sps:$4 sm:$0xff]   ;;  %v3020_v19 = vld [vmem:[#allocation14 + $0xa8] ss:$16 sps:$4 sm:$0xff]  }
  0x81   : > { %2117 = vmatmul.mubr.msk.bf16.vlgmr.msra.gmra.mxu0 %vm486_vm0, %v2402_v7  ;;  %2119 = vmatmul.mubr.msk.bf16.vlgmr.msra.gmra.mxu1 %vm486_vm0, %v2402_v7  ;;  %v3024_v20 = vld [vmem:[#allocation14 + $0x84] ss:$16 sps:$4 sm:$0xff]   ;;  %v3027_v21 = vld [vmem:[#allocation14 + $0x8c] ss:$16 sps:$4 sm:$0xff]   ;;  %v3029_v22 = vld [vmem:[#allocation14 + $0x80] ss:$16 sps:$4 sm:$0xff]  }
  0x82   : > { %815 = vmatpush1.bf16.msra.mxu0 %v2987_v8  ;;  %856 = vmatpush1.bf16.msra.mxu1 %v2991_v10  ;;  %v3032_v23 = vld [vmem:[#allocation14 + $0x88] ss:$16 sps:$4 sm:$0xff]   ;;  %v3034_v24 = vld [vmem:[#allocation14 + $0x64] ss:$16 sps:$4 sm:$0xff]   ;;  %v3040_v26 = vld [vmem:[#allocation14 + $0x6c] ss:$16 sps:$4 sm:$0xff]  }
  0x83   : > { %816 = vmatprep.subr.bf16.mxu0 %v2998_v12  ;;  %857 = vmatprep.subr.bf16.mxu1 %v3004_v14  ;;  %v2433_v25 = vld [vmem:[%s2967_s25 + $0x8] sm:$0xff]   ;;  %v3045_v27 = vld [vmem:[#allocation14 + $0x60] ss:$16 sps:$4 sm:$0xff]   ;;  %v3052_v29 = vld [vmem:[#allocation14 + $0x44] ss:$16 sps:$4 sm:$0xff]   ;;  %v446_v45 = vsub.s32 2, %v437_v44 }
  0x84   : > { %535 = vmatprep.mubr.bf16.mxu0 %v3360_v4  ;;  %588 = vmatprep.mubr.bf16.mxu1 %v3360_v4  ;;  %v3050_v28 = vld [vmem:[#allocation14 + $0x68] ss:$16 sps:$4 sm:$0xff]   ;;  %v3055_v30 = vld [vmem:[#allocation14 + $0x4c] ss:$16 sps:$4 sm:$0xff]   ;;  %v3059_v31 = vld [vmem:[#allocation14 + $0x40] ss:$16 sps:$4 sm:$0xff]  }
  0x85   : > { %v3063_v32 = vld [vmem:[#allocation14 + $0x48] ss:$16 sps:$4 sm:$0xff]   ;;  %v3065_v33 = vld [vmem:[#allocation14 + $0x24] ss:$16 sps:$4 sm:$0xff]   ;;  %v3068_v34 = vld [vmem:[#allocation14 + $0x2c] ss:$16 sps:$4 sm:$0xff]  }
  0x86   : > { %817 = vmatpush1.bf16.msra.mxu0 %v3002_v13  ;;  %858 = vmatpush1.bf16.msra.mxu1 %v3008_v15  ;;  %v3071_v35 = vld [vmem:[#allocation14 + $0x20] ss:$16 sps:$4 sm:$0xff]   ;;  %v3075_v36 = vld [vmem:[#allocation14 + $0x28] ss:$16 sps:$4 sm:$0xff]   ;;  %v3077_v37 = vld [vmem:[#allocation14 + $0x4] ss:$16 sps:$4 sm:$0xff]  }
  0x87   : > { %818 = vmatprep.subr.bf16.mxu0 %v3011_v16  ;;  %859 = vmatprep.subr.bf16.mxu1 %v3014_v17  ;;  %v3080_v38 = vld [vmem:[#allocation14 + $0xc] ss:$16 sps:$4 sm:$0xff]   ;;  %v3083_v39 = vld [vmem:[#allocation14] ss:$16 sps:$4 sm:$0xff]   ;;  %v3089_v41 = vld [vmem:[#allocation14 + $0x8] ss:$16 sps:$4 sm:$0xff]  }
  0x88   : > { %v3085_v40 = vld [vmem:[#allocation2] sm:$0xff]  ;;  %v438_v46 = vsub.s32 0, %v437_v44  ;;  %v450_v47 = vsub.s32 3, %v437_v44  ;;  %v442_v51 = vsub.s32 1, %v437_v44  ;;  %s3160_s13 = sshll.u32 %s2756_s30, 2  ;;  %p3392_p1 = scmp.ne.s32.totalorder %s3367_s14, 0 }
  0x89   : > { %2118 = vmatmul.mubr.msk.bf16.gmra.mxu0 %vm486_vm0, %v2433_v25  ;;  %2120 = vmatmul.mubr.msk.bf16.gmra.mxu1 %vm486_vm0, %v2433_v25  ;;  %v621_v42 = vpack.c.bf16 %v3085_v40, %v3085_v40  ;;  %v434_v48 = vld [vmem:[%s3350_s5] sm:$0xf]  ;;  %p919_p10 = scmp.lt.s32.totalorder %s3160_s13, 10  ;;  %s1234_s11 = sadd.s32 1, %s3160_s13 }
  0x8a   : > { %819 = vmatpush1.bf16.msra.mxu0 %v3018_v18  ;;  %860 = vmatpush1.bf16.msra.mxu1 %v3020_v19  ;;  %v447_v52 = vrot.slane %v434_v48, %v446_v45  ;;  %v439_v55 = vrot.slane %v434_v48, %v438_v46  ;;  %v451_v56 = vrot.slane %v434_v48, %v450_v47  ;;  %p1235_p9 = scmp.lt.s32.totalorder %s1234_s11, 10  ;;  %s1551_s18 = sadd.s32 2, %s3160_s13 }
  0x8b   : > { %820 = vmatprep.subr.bf16.mxu0 %v3024_v20  ;;  %861 = vmatprep.subr.bf16.mxu1 %v3027_v21  ;;  %v443_v59 = vrot.slane %v434_v48, %v442_v51  ;;  %s920_s15 = scalar_select %p919_p10, 1, 0 }
  0x8c   : > { %846 = vmatprep.mubr.bf16.mxu0 %v3360_v4  ;;  %887 = vmatprep.mubr.bf16.mxu1 %v3360_v4  ;;  %s1236_s26 = scalar_select %p1235_p9, 1, 0 }
  0x8d   : > { %s921_s17 = scvt.s32.f32 %s920_s15  ;;  %p1552_p12 = scmp.lt.s32.totalorder %s1551_s18, 10 }
  0x8e   : > { %821 = vmatpush1.bf16.msra.mxu0 %v3029_v22  ;;  %862 = vmatpush1.bf16.msra.mxu1 %v3032_v23  ;;  %s1237_s20 = scvt.s32.f32 %s1236_s26  ;;  %s1868_s3 = sadd.s32 3, %s3160_s13 }
  0x8f   : > { %822 = vmatprep.subr.bf16.mxu0 %v3034_v24  ;;  %863 = vmatprep.subr.bf16.mxu1 %v3040_v26  ;;  %s924_s19 = ssub.f32 1.0, %s921_s17  ;;  %p1869_p13 = scmp.lt.s32.totalorder %s1868_s3, 10 }
  0x90   : > { %s1240_s1 = ssub.f32 1.0, %s1237_s20  ;;  %s2776_s13 = smov [#allocation16]  }
  0x91   : > { %s1553_s23 = scalar_select %p1552_p12, 1, 0 }
  0x92   : > { %823 = vmatpush1.bf16.msra.mxu0 %v3045_v27  ;;  %864 = vmatpush1.bf16.msra.mxu1 %v3050_v28  ;;  %s1870_s4 = scalar_select %p1869_p13, 1, 0 }
  0x93   : > { %824 = vmatprep.subr.bf16.mxu0 %v3052_v29  ;;  %865 = vmatprep.subr.bf16.mxu1 %v3055_v30  ;;  %s1554_s24 = scvt.s32.f32 %s1553_s23  ;;  %s2260_s11 = sshll.u32 %s2756_s30, 8 }
  0x94   : > { %s1871_s15 = scvt.s32.f32 %s1870_s4  ;;  %s1914_s26 = sshll.u32 %s2981_s2, 4  ;;  %s3278_s26 = int_to_ptr.vmem [resolvable:$true] %s1914_s26 }
  0x95   : > { %s1557_s25 = ssub.f32 1.0, %s1554_s24 }
  0x96   : > { %825 = vmatpush1.bf16.msra.mxu0 %v3059_v31  ;;  %866 = vmatpush1.bf16.msra.mxu1 %v3063_v32 }
  0x97   : > { %826 = vmatprep.subr.bf16.mxu0 %v3065_v33  ;;  %867 = vmatprep.subr.bf16.mxu1 %v3068_v34 }
  0x9a   : > { %827 = vmatpush1.bf16.msra.mxu0 %v3071_v35  ;;  %868 = vmatpush1.bf16.msra.mxu1 %v3075_v36 }
  0x9b   : > { %828 = vmatprep.subr.bf16.mxu0 %v3077_v37  ;;  %869 = vmatprep.subr.bf16.mxu1 %v3080_v38 }
  0x9e   : > { %829 = vmatpush1.bf16.msra.mxu0 %v3083_v39  ;;  %870 = vmatpush1.bf16.msra.mxu1 %v3089_v41 }
  0x9f   : > { %1130 = vmatprep.subr.bf16.mxu0 %v2989_v9  ;;  %1171 = vmatprep.subr.bf16.mxu1 %v2994_v11 }
  0xa1   : > { %847 = vmatmul.mubr.bf16.vlgmr.msra.gmra.mxu0 %v621_v42  ;;  %888 = vmatmul.mubr.bf16.vlgmr.msra.gmra.mxu1 %v621_v42 }
  0xa2   : > { %1131 = vmatpush1.bf16.msra.mxu0 %v2987_v8  ;;  %1172 = vmatpush1.bf16.msra.mxu1 %v2991_v10 }
  0xa3   : > { %1132 = vmatprep.subr.bf16.mxu0 %v2998_v12  ;;  %1173 = vmatprep.subr.bf16.mxu1 %v3004_v14 }
  0xa4   : > { %1162 = vmatprep.mubr.bf16.mxu0 %v3360_v4  ;;  %1203 = vmatprep.mubr.bf16.mxu1 %v3360_v4 }
  0xa6   : > { %1133 = vmatpush1.bf16.msra.mxu0 %v3002_v13  ;;  %1174 = vmatpush1.bf16.msra.mxu1 %v3008_v15 }
  0xa7   : > { %1134 = vmatprep.subr.bf16.mxu0 %v3011_v16  ;;  %1175 = vmatprep.subr.bf16.mxu1 %v3014_v17 }
  0xaa   : > { %1135 = vmatpush1.bf16.msra.mxu0 %v3018_v18  ;;  %1176 = vmatpush1.bf16.msra.mxu1 %v3020_v19 }
  0xab   : > { %1136 = vmatprep.subr.bf16.mxu0 %v3024_v20  ;;  %1177 = vmatprep.subr.bf16.mxu1 %v3027_v21 }
  0xae   : > { %1137 = vmatpush1.bf16.msra.mxu0 %v3029_v22  ;;  %1178 = vmatpush1.bf16.msra.mxu1 %v3032_v23 }
  0xaf   : > { %1138 = vmatprep.subr.bf16.mxu0 %v3034_v24  ;;  %1179 = vmatprep.subr.bf16.mxu1 %v3040_v26 }
  0xb2   : > { %1139 = vmatpush1.bf16.msra.mxu0 %v3045_v27  ;;  %1180 = vmatpush1.bf16.msra.mxu1 %v3050_v28 }
  0xb3   : > { %1140 = vmatprep.subr.bf16.mxu0 %v3052_v29  ;;  %1181 = vmatprep.subr.bf16.mxu1 %v3055_v30 }
  0xb6   : > { %1141 = vmatpush1.bf16.msra.mxu0 %v3059_v31  ;;  %1182 = vmatpush1.bf16.msra.mxu1 %v3063_v32 }
  0xb7   : > { %1142 = vmatprep.subr.bf16.mxu0 %v3065_v33  ;;  %1183 = vmatprep.subr.bf16.mxu1 %v3068_v34 }
  0xba   : > { %1143 = vmatpush1.bf16.msra.mxu0 %v3071_v35  ;;  %1184 = vmatpush1.bf16.msra.mxu1 %v3075_v36 }
  0xbb   : > { %1144 = vmatprep.subr.bf16.mxu0 %v3077_v37  ;;  %1185 = vmatprep.subr.bf16.mxu1 %v3080_v38 }
  0xbe   : > { %1145 = vmatpush1.bf16.msra.mxu0 %v3083_v39  ;;  %1186 = vmatpush1.bf16.msra.mxu1 %v3089_v41 }
  0xbf   : > { %1447 = vmatprep.subr.bf16.mxu0 %v2989_v9  ;;  %1488 = vmatprep.subr.bf16.mxu1 %v2994_v11 }
 0x141   : > { %v527_v49 = vpop.f32.mrf.mxu0  ;;  %v580_v50 = vpop.f32.mrf.mxu1 }
 0x143   : > { %v529_v53 = vpop.f32.mrf.mxu0  ;;  %v582_v54 = vpop.f32.mrf.mxu1 }
 0x145   : > { %v531_v57 = vpop.f32.mrf.mxu0  ;;  %v584_v58 = vpop.f32.mrf.mxu1 }
 0x146   : > { %v3135_v60 = vadd.f32 %v531_v57, %v439_v55  ;;  %v3137_v61 = vadd.f32 %v584_v58, %v447_v52 }
 0x147   : > { %v533_v62 = vpop.f32.mrf.mxu0  ;;  %v586_v63 = vpop.f32.mrf.mxu1 }
 0x148   : > { %v3139_v0 = vadd.f32 %v533_v62, %v443_v59  ;;  %v3141_v1 = vadd.f32 %v586_v63, %v451_v56  ;;  %v528_v62 = vadd.f32 %v527_v49, %v439_v55 }
 0x149   : > { %v537_v2 = vpop.f32.mrf.mxu0  ;;  %v590_v3 = vpop.f32.mrf.mxu1 }
 0x14a   : > { %v3143_v5 = vadd.f32 %v537_v2, %v439_v55  ;;  %v3145_v6 = vadd.f32 %v590_v3, %v447_v52  ;;  %v530_v2 = vadd.f32 %v529_v53, %v443_v59  ;;  %v583_v53 = vadd.f32 %v582_v54, %v451_v56 }
 0x14b   : > { %v539_v7 = vpop.f32.mrf.mxu0  ;;  %v592_v25 = vpop.f32.mrf.mxu1 }
 0x14c   : > { %3383 = vst [vmem:[#allocation25_spill] sm:$0xff] %v3145_v6  ;;  %v3147_v42 = vadd.f32 %v539_v7, %v443_v59  ;;  %v3149_v43 = vadd.f32 %v592_v25, %v451_v56 }
 0x14d   : > { %v541_v44 = vpop.f32.mrf.mxu0  ;;  %v594_v45 = vpop.f32.mrf.mxu1 }
 0x14e   : > { %3384 = vst [vmem:[#allocation26_spill] sm:$0xff] %v3149_v43  ;;  %v3151_v46 = vadd.f32 %v541_v44, %v439_v55  ;;  %v3153_v47 = vadd.f32 %v594_v45, %v447_v52 }
 0x14f   : > { %v543_v48 = vpop.f32.mrf.mxu0  ;;  %v596_v51 = vpop.f32.mrf.mxu1 }
 0x150   : > { %3385 = vst [vmem:[#allocation27_spill] sm:$0xff] %v3151_v46  ;;  %3386 = vst [vmem:[#allocation28_spill] sm:$0xff] %v3153_v47  ;;  %v3155_v57 = vadd.f32 %v543_v48, %v443_v59  ;;  %v3157_v58 = vadd.f32 %v596_v51, %v451_v56  ;;  %v581_v46 = vadd.f32 %v580_v50, %v447_v52 }
 0x161   : > { %v848_v63 = vpop.f32.mrf.mxu0  ;;  %v889_v7 = vpop.f32.mrf.mxu1 }
 0x162   : > { %v896_v3 = vadd.f32 %v848_v63, %v528_v62  ;;  %v898_v51 = vadd.f32 %v889_v7, %v581_v46  ;;  %v925_v46 = vstv %s924_s19  ;;  %s1930_s19 = sshll.u32 %s2776_s13, 4  ;;  %s1931_s19 = int_to_ptr.vmem [resolvable:$true] %s1930_s19 }
 0x163   : > { %v850_v25 = vpop.f32.mrf.mxu0  ;;  %v891_v6 = vpop.f32.mrf.mxu1  ;;  %s2624_s30 = scalar_lea.vmem %s1931_s19, 128  ;;  %p2631_p3 = scmp.lt.s32.totalorder %s1931_s19, %s1931_s19 }
 0x164   : > { %v900_v4 = vmul.f32 0.5, %v896_v3  ;;  %v897_v43 = vadd.f32 %v850_v25, %v530_v2  ;;  %v899_v55 = vadd.f32 %v891_v6, %v583_v53  ;;  %v922_v25 = vstv %s921_s17  ;;  %s1874_s17 = ssub.f32 1.0, %s1871_s15  ;;  %p2625_p0 = scmp.ne.s32.totalorder %s1931_s19, %s2624_s30 }
 0x165   : > { %v852_v44 = vpop.f32.mrf.mxu0  ;;  %v893_v48 = vpop.f32.mrf.mxu1  ;;  %p2632_p5 = scmp.lt.s32.totalorder %s2624_s30, %s2624_s30 }
 0x166   : > { %2452 = vtanh.f32 %v900_v4  ;;  %v904_v45 = vmul.f32 0.5, %v897_v43  ;;  %v909_v59 = vmul.f32 0.5, %v899_v55  ;;  %v616_v43 = vld [vmem:[#allocation3] sm:$0xff]  ;;  %v926_v55 = vmul.f32 %v925_v46, %v3085_v40  ;;  %p2626_p11 = pnand %p2625_p0, %p3392_p1 }
 0x167   : > { %v853_v47 = vpop.f32.mrf.mxu0  ;;  %v894_v49 = vpop.f32.mrf.mxu1  ;;  %v929_v56 = vmul.f32 %v925_v46, %v616_v43  ;;  %p2633_p4 = por %p2632_p5, %p2631_p3 }
 0x168   : > { %2454 = vtanh.f32 %v904_v45  ;;  %p2627_p6 = pneg %p2626_p11 }
 0x169   : > { %2456 = vtanh.f32 %v898_v51 }
 0x16a   : > { %2458 = vtanh.f32 %v909_v59  ;;  %p2634_p2 = pnand %p2633_p4, %p2627_p6 }
 0x173   : > { %v2453_v62 = vpop.eup %2452 }
 0x174   : > { %v902_v63 = vadd.f32 1.0, %v2453_v62 }
 0x175   : > { %v2455_v50 = vpop.eup %2454 }
 0x176   : > { %v903_v4 = vmul.f32 0.5, %v902_v63  ;;  %v906_v52 = vadd.f32 1.0, %v2455_v50  ;;  %v2457_v47 = vpop.eup %2456  ;;  %v3387_v50 = vmov 0  }
 0x177   : > { %v2459_v45 = vpop.eup %2458 }
 0x178   : > { %v907_v2 = vmul.f32 0.5, %v906_v52  ;;  %v914_v7 = vmul.f32 %v2457_v47, %v903_v4  ;;  %v911_v48 = vadd.f32 1.0, %v2459_v45 }
 0x17a   : > { %v913_v3 = vmul.f32 %v907_v2, %v616_v43  ;;  %v912_v51 = vmul.f32 0.5, %v911_v48 }
 0x17c   : > { %v915_v54 = vadd.f32 %v914_v7, %v913_v3 }
 0x17e   : > { %2460 = vtanh.f32 %v915_v54  ;;  %v928_v6 = vmul.f32 %v922_v25, %v915_v54 }
 0x180   : > { %v3163_v44 = vadd.f32 %v929_v56, %v928_v6 }
 0x18b   : > { %v2461_v49 = vpop.eup %2460 }
 0x18c   : > { %v917_v53 = vmul.f32 %v2461_v49, %v912_v51 }
 0x18e   : > { %v923_v59 = vmul.f32 %v922_v25, %v917_v53 }
 0x190   : > { %v3166_v62 = vadd.f32 %v926_v55, %v923_v59  ;;  %v1238_v59 = vstv %s1237_s20  ;;  %s2777_s20 = smov [#allocation18]  }
 0x192   : > { %v937_v63 = vpack.c.bf16 %v3166_v62, %v3166_v62 }
 0x194   : > { %1163 = vmatmul.mubr.bf16.vlgmr.msra.gmra.mxu0 %v937_v63  ;;  %1204 = vmatmul.mubr.bf16.vlgmr.msra.gmra.mxu1 %v937_v63  ;;  %v1241_v63 = vstv %s1240_s1  ;;  %s1943_s1 = sshll.u32 %s2777_s20, 4  ;;  %s1944_s1 = int_to_ptr.vmem [resolvable:$true] %s1943_s1 }
 0x195   : > { %1448 = vmatpush1.bf16.msra.mxu0 %v2987_v8  ;;  %1489 = vmatpush1.bf16.msra.mxu1 %v2991_v10 }
 0x196   : > { %1449 = vmatprep.subr.bf16.mxu0 %v2998_v12  ;;  %1490 = vmatprep.subr.bf16.mxu1 %v3004_v14 }
 0x197   : > { %1479 = vmatprep.mubr.bf16.mxu0 %v3387_v50  ;;  %1520 = vmatprep.mubr.bf16.mxu1 %v3387_v50 }
 0x199   : > { %1450 = vmatpush1.bf16.msra.mxu0 %v3002_v13  ;;  %1491 = vmatpush1.bf16.msra.mxu1 %v3008_v15 }
 0x19a   : > { %1451 = vmatprep.subr.bf16.mxu0 %v3011_v16  ;;  %1492 = vmatprep.subr.bf16.mxu1 %v3014_v17 }
 0x19d   : > { %1452 = vmatpush1.bf16.msra.mxu0 %v3018_v18  ;;  %1493 = vmatpush1.bf16.msra.mxu1 %v3020_v19 }
 0x19e   : > { %1453 = vmatprep.subr.bf16.mxu0 %v3024_v20  ;;  %1494 = vmatprep.subr.bf16.mxu1 %v3027_v21 }
 0x1a1   : > { %1454 = vmatpush1.bf16.msra.mxu0 %v3029_v22  ;;  %1495 = vmatpush1.bf16.msra.mxu1 %v3032_v23 }
 0x1a2   : > { %1455 = vmatprep.subr.bf16.mxu0 %v3034_v24  ;;  %1496 = vmatprep.subr.bf16.mxu1 %v3040_v26 }
 0x1a5   : > { %1456 = vmatpush1.bf16.msra.mxu0 %v3045_v27  ;;  %1497 = vmatpush1.bf16.msra.mxu1 %v3050_v28 }
 0x1a6   : > { %1457 = vmatprep.subr.bf16.mxu0 %v3052_v29  ;;  %1498 = vmatprep.subr.bf16.mxu1 %v3055_v30 }
 0x1a9   : > { %1458 = vmatpush1.bf16.msra.mxu0 %v3059_v31  ;;  %1499 = vmatpush1.bf16.msra.mxu1 %v3063_v32 }
 0x1aa   : > { %1459 = vmatprep.subr.bf16.mxu0 %v3065_v33  ;;  %1500 = vmatprep.subr.bf16.mxu1 %v3068_v34 }
 0x1ad   : > { %1460 = vmatpush1.bf16.msra.mxu0 %v3071_v35  ;;  %1501 = vmatpush1.bf16.msra.mxu1 %v3075_v36 }
 0x1ae   : > { %1461 = vmatprep.subr.bf16.mxu0 %v3077_v37  ;;  %1502 = vmatprep.subr.bf16.mxu1 %v3080_v38 }
 0x1b1   : > { %1462 = vmatpush1.bf16.msra.mxu0 %v3083_v39  ;;  %1503 = vmatpush1.bf16.msra.mxu1 %v3089_v41 }
 0x1b2   : > { %1764 = vmatprep.subr.bf16.mxu0 %v2989_v9  ;;  %1805 = vmatprep.subr.bf16.mxu1 %v2994_v11 }
 0x254   : > { %v1164_v40 = vpop.f32.mrf.mxu0  ;;  %v1205_v4 = vpop.f32.mrf.mxu1 }
 0x255   : > { %v1212_v52 = vadd.f32 %v1164_v40, %v3135_v60  ;;  %v1214_v25 = vadd.f32 %v1205_v4, %v3137_v61  ;;  %v1245_v4 = vmul.f32 %v1241_v63, %v3163_v44 }
 0x256   : > { %v1166_v43 = vpop.f32.mrf.mxu0  ;;  %v1207_v2 = vpop.f32.mrf.mxu1 }
 0x257   : > { %v1216_v47 = vmul.f32 0.5, %v1212_v52  ;;  %v1213_v46 = vadd.f32 %v1166_v43, %v3139_v0  ;;  %v1215_v11 = vadd.f32 %v1207_v2, %v3141_v1 }
 0x258   : > { %v1168_v3 = vpop.f32.mrf.mxu0  ;;  %v1209_v7 = vpop.f32.mrf.mxu1 }
 0x259   : > { %2462 = vtanh.f32 %v1216_v47  ;;  %v1220_v54 = vmul.f32 0.5, %v1213_v46  ;;  %v1225_v60 = vmul.f32 0.5, %v1215_v11 }
 0x25a   : > { %v1169_v56 = vpop.f32.mrf.mxu0  ;;  %v1210_v9 = vpop.f32.mrf.mxu1 }
 0x25b   : > { %2464 = vtanh.f32 %v1220_v54 }
 0x25c   : > { %2466 = vtanh.f32 %v1214_v25  ;;  %v1242_v25 = vmul.f32 %v1241_v63, %v3166_v62 }
 0x25d   : > { %2468 = vtanh.f32 %v1225_v60 }
 0x266   : > { %v2463_v6 = vpop.eup %2462 }
 0x267   : > { %v1218_v45 = vadd.f32 1.0, %v2463_v6 }
 0x268   : > { %v2465_v0 = vpop.eup %2464 }
 0x269   : > { %v1219_v48 = vmul.f32 0.5, %v1218_v45  ;;  %v1222_v51 = vadd.f32 1.0, %v2465_v0  ;;  %v2467_v49 = vpop.eup %2466 }
 0x26a   : > { %v2469_v43 = vpop.eup %2468 }
 0x26b   : > { %v1223_v61 = vmul.f32 0.5, %v1222_v51  ;;  %v1230_v53 = vmul.f32 %v2467_v49, %v1219_v48  ;;  %v1227_v2 = vadd.f32 1.0, %v2469_v43 }
 0x26d   : > { %v1229_v55 = vmul.f32 %v1223_v61, %v3163_v44  ;;  %v1228_v47 = vmul.f32 0.5, %v1227_v2  ;;  %v3390_v61 = vld [vmem:[#allocation27_spill] sm:$0xff] }
 0x26f   : > { %v1231_v40 = vadd.f32 %v1230_v53, %v1229_v55 }
 0x271   : > { %2470 = vtanh.f32 %v1231_v40  ;;  %v1244_v1 = vmul.f32 %v1238_v59, %v1231_v40 }
 0x273   : > { %v3211_v52 = vadd.f32 %v1245_v4, %v1244_v1 }
 0x27e   : > { %v2471_v46 = vpop.eup %2470 }
 0x27f   : > { %v1233_v3 = vmul.f32 %v2471_v46, %v1228_v47 }
 0x281   : > { %v1239_v7 = vmul.f32 %v1238_v59, %v1233_v3 }
 0x283   : > { %v3214_v54 = vadd.f32 %v1242_v25, %v1239_v7 }
 0x285   : > { %v1254_v56 = vpack.c.bf16 %v3214_v54, %v3214_v54  ;;  %v2264_v9 = vpack.c.bf16 %v3214_v54, %v3166_v62 }
 0x287   : > { %1480 = vmatmul.mubr.bf16.vlgmr.msra.gmra.mxu0 %v1254_v56  ;;  %1521 = vmatmul.mubr.bf16.vlgmr.msra.gmra.mxu1 %v1254_v56  ;;  %2265 = vst [vmem:[%s2981_s2] sm:$0xff] %v2264_v9  }
 0x288   : > { %1765 = vmatpush1.bf16.msra.mxu0 %v2987_v8  ;;  %1806 = vmatpush1.bf16.msra.mxu1 %v2991_v10 }
 0x289   : > { %1766 = vmatprep.subr.bf16.mxu0 %v2998_v12  ;;  %1807 = vmatprep.subr.bf16.mxu1 %v3004_v14 }
 0x28a   : > { %1796 = vmatprep.mubr.bf16.mxu0 %v3387_v50  ;;  %1837 = vmatprep.mubr.bf16.mxu1 %v3387_v50 }
 0x28c   : > { %1767 = vmatpush1.bf16.msra.mxu0 %v3002_v13  ;;  %1808 = vmatpush1.bf16.msra.mxu1 %v3008_v15 }
 0x28d   : > { %1768 = vmatprep.subr.bf16.mxu0 %v3011_v16  ;;  %1809 = vmatprep.subr.bf16.mxu1 %v3014_v17 }
 0x290   : > { %1769 = vmatpush1.bf16.msra.mxu0 %v3018_v18  ;;  %1810 = vmatpush1.bf16.msra.mxu1 %v3020_v19  ;;  %v3388_v19 = vld [vmem:[#allocation25_spill] sm:$0xff] }
 0x291   : > { %1770 = vmatprep.subr.bf16.mxu0 %v3024_v20  ;;  %1811 = vmatprep.subr.bf16.mxu1 %v3027_v21 }
 0x294   : > { %1771 = vmatpush1.bf16.msra.mxu0 %v3029_v22  ;;  %1812 = vmatpush1.bf16.msra.mxu1 %v3032_v23 }
 0x295   : > { %1772 = vmatprep.subr.bf16.mxu0 %v3034_v24  ;;  %1813 = vmatprep.subr.bf16.mxu1 %v3040_v26  ;;  %v3389_v24 = vld [vmem:[#allocation26_spill] sm:$0xff] }
 0x298   : > { %1773 = vmatpush1.bf16.msra.mxu0 %v3045_v27  ;;  %1814 = vmatpush1.bf16.msra.mxu1 %v3050_v28 }
 0x299   : > { %1774 = vmatprep.subr.bf16.mxu0 %v3052_v29  ;;  %1815 = vmatprep.subr.bf16.mxu1 %v3055_v30 }
 0x29c   : > { %1775 = vmatpush1.bf16.msra.mxu0 %v3059_v31  ;;  %1816 = vmatpush1.bf16.msra.mxu1 %v3063_v32 }
 0x29d   : > { %1776 = vmatprep.subr.bf16.mxu0 %v3065_v33  ;;  %1817 = vmatprep.subr.bf16.mxu1 %v3068_v34 }
 0x2a0   : > { %1777 = vmatpush1.bf16.msra.mxu0 %v3071_v35  ;;  %1818 = vmatpush1.bf16.msra.mxu1 %v3075_v36 }
 0x2a1   : > { %1778 = vmatprep.subr.bf16.mxu0 %v3077_v37  ;;  %1819 = vmatprep.subr.bf16.mxu1 %v3080_v38  ;;  %v1555_v37 = vstv %s1554_s24  ;;  %v1558_v38 = vstv %s1557_s25  ;;  %s3276_s24 = scalar_lea.hbm %s3351_s6, %s2260_s11 }
 0x2a2   : > { %v1559_v45 = vmul.f32 %v1558_v38, %v3214_v54 }
 0x2a4   : > { %1779 = vmatpush1.bf16.msra.mxu0 %v3083_v39  ;;  %1820 = vmatpush1.bf16.msra.mxu1 %v3089_v41 }
 0x347   : > { %v1481_v8 = vpop.f32.mrf.mxu0  ;;  %v1522_v10 = vpop.f32.mrf.mxu1 }
 0x348   : > { %v1529_v12 = vadd.f32 %v1481_v8, %v3143_v5  ;;  %v1531_v20 = vadd.f32 %v1522_v10, %v3388_v19  ;;  %v1562_v5 = vmul.f32 %v1558_v38, %v3211_v52 }
 0x349   : > { %v1483_v13 = vpop.f32.mrf.mxu0  ;;  %v1524_v14 = vpop.f32.mrf.mxu1 }
 0x34a   : > { %v1533_v15 = vmul.f32 0.5, %v1529_v12  ;;  %v1530_v16 = vadd.f32 %v1483_v13, %v3147_v42  ;;  %v1532_v26 = vadd.f32 %v1524_v14, %v3389_v24  ;;  %v1872_v14 = vstv %s1871_s15 }
 0x34b   : > { %v1485_v17 = vpop.f32.mrf.mxu0  ;;  %v1526_v18 = vpop.f32.mrf.mxu1 }
 0x34c   : > { %2472 = vtanh.f32 %v1533_v15  ;;  %v1537_v21 = vmul.f32 0.5, %v1530_v16  ;;  %v1542_v27 = vmul.f32 0.5, %v1532_v26  ;;  %v1875_v15 = vstv %s1874_s17 }
 0x34d   : > { %v1486_v22 = vpop.f32.mrf.mxu0  ;;  %v1527_v23 = vpop.f32.mrf.mxu1 }
 0x34e   : > { %2474 = vtanh.f32 %v1537_v21 }
 0x34f   : > { %2476 = vtanh.f32 %v1531_v20 }
 0x350   : > { %2478 = vtanh.f32 %v1542_v27 }
 0x359   : > { %v2473_v28 = vpop.eup %2472 }
 0x35a   : > { %v1535_v29 = vadd.f32 1.0, %v2473_v28 }
 0x35b   : > { %v2475_v30 = vpop.eup %2474 }
 0x35c   : > { %v1536_v31 = vmul.f32 0.5, %v1535_v29  ;;  %v1539_v32 = vadd.f32 1.0, %v2475_v30  ;;  %v2477_v33 = vpop.eup %2476 }
 0x35d   : > { %v2479_v44 = vpop.eup %2478 }
 0x35e   : > { %v1540_v34 = vmul.f32 0.5, %v1539_v32  ;;  %v1547_v35 = vmul.f32 %v2477_v33, %v1536_v31  ;;  %v1544_v62 = vadd.f32 1.0, %v2479_v44 }
 0x360   : > { %v1546_v36 = vmul.f32 %v1540_v34, %v3211_v52  ;;  %v1545_v50 = vmul.f32 0.5, %v1544_v62  ;;  %v3391_v52 = vld [vmem:[#allocation28_spill] sm:$0xff] }
 0x362   : > { %v1548_v39 = vadd.f32 %v1547_v35, %v1546_v36 }
 0x364   : > { %2480 = vtanh.f32 %v1548_v39  ;;  %v1561_v41 = vmul.f32 %v1555_v37, %v1548_v39 }
 0x366   : > { %v1563_v42 = vadd.f32 %v1562_v5, %v1561_v41 }
 0x368   : > { %v1879_v17 = vmul.f32 %v1875_v15, %v1563_v42 }
 0x371   : > { %v2481_v11 = vpop.eup %2480 }
 0x372   : > { %v1550_v60 = vmul.f32 %v2481_v11, %v1545_v50 }
 0x374   : > { %v1556_v6 = vmul.f32 %v1555_v37, %v1550_v60 }
 0x376   : > { %v3261_v0 = vadd.f32 %v1559_v45, %v1556_v6 }
 0x378   : > { %v1571_v48 = vpack.c.bf16 %v3261_v0, %v3261_v0  ;;  %v1876_v26 = vmul.f32 %v1875_v15, %v3261_v0 }
 0x37a   : > { %1797 = vmatmul.mubr.bf16.vlgmr.msra.gmra.mxu0 %v1571_v48  ;;  %1838 = vmatmul.mubr.bf16.vlgmr.msra.gmra.mxu1 %v1571_v48 }
 0x43a   : > { %v1798_v51 = vpop.f32.mrf.mxu0  ;;  %v1839_v49 = vpop.f32.mrf.mxu1 }
 0x43b   : > { %v1846_v53 = vadd.f32 %v1798_v51, %v3390_v61  ;;  %v1848_v43 = vadd.f32 %v1839_v49, %v3391_v52 }
 0x43c   : > { %v1800_v55 = vpop.f32.mrf.mxu0  ;;  %v1841_v59 = vpop.f32.mrf.mxu1 }
 0x43d   : > { %v1850_v63 = vmul.f32 0.5, %v1846_v53  ;;  %v1847_v40 = vadd.f32 %v1800_v55, %v3155_v57  ;;  %v1849_v3 = vadd.f32 %v1841_v59, %v3157_v58 }
 0x43e   : > { %v1802_v1 = vpop.f32.mrf.mxu0  ;;  %v1843_v4 = vpop.f32.mrf.mxu1 }
 0x43f   : > { %2482 = vtanh.f32 %v1850_v63  ;;  %v1854_v2 = vmul.f32 0.5, %v1847_v40  ;;  %v1859_v7 = vmul.f32 0.5, %v1849_v3 }
 0x440   : > { %v1803_v47 = vpop.f32.mrf.mxu0  ;;  %v1844_v46 = vpop.f32.mrf.mxu1 }
 0x441   : > { %2484 = vtanh.f32 %v1854_v2 }
 0x442   : > { %2486 = vtanh.f32 %v1848_v43 }
 0x443   : > { %2488 = vtanh.f32 %v1859_v7 }
 0x44c   : > { %v2483_v25 = vpop.eup %2482 }
 0x44d   : > { %v1852_v54 = vadd.f32 1.0, %v2483_v25 }
 0x44e   : > { %v2485_v57 = vpop.eup %2484 }
 0x44f   : > { %v1853_v56 = vmul.f32 0.5, %v1852_v54  ;;  %v1856_v9 = vadd.f32 1.0, %v2485_v57  ;;  %v2487_v8 = vpop.eup %2486 }
 0x450   : > { %v2489_v19 = vpop.eup %2488 }
 0x451   : > { %v1857_v10 = vmul.f32 0.5, %v1856_v9  ;;  %v1864_v12 = vmul.f32 %v2487_v8, %v1853_v56  ;;  %v1861_v20 = vadd.f32 1.0, %v2489_v19 }
 0x453   : > { %v1863_v13 = vmul.f32 %v1857_v10, %v1563_v42  ;;  %v1862_v21 = vmul.f32 0.5, %v1861_v20 }
 0x455   : > { %v1865_v16 = vadd.f32 %v1864_v12, %v1863_v13 }
 0x457   : > { %2490 = vtanh.f32 %v1865_v16  ;;  %v1878_v58 = vmul.f32 %v1872_v14, %v1865_v16 }
 0x459   : > { %v1880_v18 = vadd.f32 %v1879_v17, %v1878_v58 }
 0x45b   : > { %1884 = vst [vmem:[#allocation3] sm:$0xff] %v1880_v18  ;;  %1886 = vst [vmem:[#allocation18] sm:$0xff] %v1880_v18 }
 0x464   : > { %v2491_v22 = vpop.eup %2490 }
 0x465   : > { %v1867_v23 = vmul.f32 %v2491_v22, %v1862_v21 }
 0x467   : > { %v1873_v24 = vmul.f32 %v1872_v14, %v1867_v23 }
 0x469   : > { %v1877_v27 = vadd.f32 %v1876_v26, %v1873_v24 }
 0x46b   : > { %1883 = vst [vmem:[#allocation2] sm:$0xff] %v1877_v27  ;;  %1885 = vst [vmem:[#allocation16] sm:$0xff] %v1877_v27  ;;  %v2269_v28 = vpack.c.bf16 %v1877_v27, %v3261_v0 }
 0x46c   : > { %2637 = shalt.err (!%p2634_p2)
}
 0x46d   : > { %2292 = dma.vmem_to_hbm [thread:$0]  (%p3392_p1), %s1931_s19, 128, %s3352_s7, [#allocation17]   ;;  %2271 = vst [vmem:[%s2981_s2 + $0x8] sm:$0xff] %v2269_v28  }
 0x46e   : > { %s2648_s4 = scalar_lea.vmem %s1944_s1, 128  ;;  %p2655_p12 = scmp.lt.s32.totalorder %s1944_s1, %s1944_s1 }
 0x46f   : > { %p2649_p7 = scmp.ne.s32.totalorder %s1944_s1, %s2648_s4  ;;  %p2656_p13 = scmp.lt.s32.totalorder %s2648_s4, %s2648_s4 }
 0x471   : > { %p2650_p10 = pnand %p2649_p7, %p3392_p1  ;;  %p2657_p0 = por %p2656_p13, %p2655_p12 }
 0x473   : > { %p2651_p9 = pneg %p2650_p10 }
 0x475   : > { %p2658_p11 = pnand %p2657_p0, %p2651_p9 }
 0x477   : > { %2661 = shalt.err (!%p2658_p11)
}
 0x478   : > { %2294 = dma.vmem_to_hbm [thread:$0]  (%p3392_p1), %s1944_s1, 128, %s3353_s8, [#allocation17]  }
 0x479   : > { %s1900_s2 = scalar_lea.sflag [#allocation8], %s2963_s21  ;;  %s2672_s13 = scalar_lea.vmem %s3278_s26, 256 }
 0x47a   : > { %p2673_p6 = scmp.ne.s32.totalorder %s3278_s26, %s2672_s13  ;;  %s2778_s19 = smov [#allocation15]  }
 0x47b   : > { %s2676_s11 = sshll.u32 %s2778_s19, 4  ;;  %s2677_s11 = int_to_ptr.vmem [resolvable:$false] %s2676_s11 }
 0x47c   : > { %p2674_p3 = pnand %p2673_p6, %p2936_p8  ;;  %s2678_s20 = scalar_lea.vmem %s2677_s11, 512 }
 0x47d   : > { %p2679_p4 = scmp.lt.s32.totalorder %s3278_s26, %s2677_s11  ;;  %p2680_p2 = scmp.lt.s32.totalorder %s2678_s20, %s2672_s13 }
 0x47e   : > { %p2675_p5 = pneg %p2674_p3 }
 0x47f   : > { %p2681_p7 = por %p2680_p2, %p2679_p4 }
 0x481   : > { %p2682_p10 = pnand %p2681_p7, %p2675_p5 }
 0x483   : > { %2685 = shalt.err (!%p2682_p10)
}
 0x484   : > { %s2686_s1 = scalar_lea.hbm %s3276_s24, 256  ;;  %s2690_s30 = scalar_lea.hbm %s3351_s6, 768 }
 0x485   : > { %p2687_p9 = scmp.ne.s32.totalorder %s3276_s24, %s2686_s1  ;;  %p2691_p0 = scmp.lt.s32.totalorder %s3276_s24, %s3351_s6 }
 0x486   : > { %p2692_p11 = scmp.lt.s32.totalorder %s2690_s30, %s2686_s1 }
 0x487   : > { %p2688_p12 = pnand %p2687_p9, %p2936_p8 }
 0x488   : > { %p2693_p6 = por %p2692_p11, %p2691_p0 }
 0x489   : > { %p2689_p13 = pneg %p2688_p12 }
 0x48b   : > { %p2694_p3 = pnand %p2693_p6, %p2689_p13 }
 0x48d   : > { %2697 = shalt.err (!%p2694_p3)
}
 0x48e   : > { %s2779_s4 = smov 64   ;;  %s2780_s15 = smov 4  }
 0x48f   : > { %2290 = dma.vmem_to_hbm [thread:$0]  (%p2936_p8), %s3278_s26, 256, %s3276_s24, %s1900_s2, %s2779_s4, %s2779_s4, %s2780_s15  }
 0x490   : > { %2735 = dma.done.wait (%p3392_p1), [#allocation17], 256  }
 0x491   : > { %2737 = vsyncadd (%p3392_p1), [#allocation17], 4294967040 }
 0x492 PF: > { %p2334_p5 = scmp.ge.s32.totalorder %s2764_s10, 2  ;;  %s1963_s17 = sand.u32 1, %s2744_s27  }
 0x493   : > { %p3393_p4 = scmp.ne.s32.totalorder %s3369_s16, 0  ;;  %s1964_s13 = scalar_lea.sflag [#allocation8], %s1963_s17 }
 0x495   : > { %p2318_p2 = pnand %p2334_p5, %p3393_p4 }
 0x497   : > { %p2319_p7 = pneg %p2318_p2 }
 0x499   : > { %2739 = dma.done.wait (%p2319_p7), %s1964_s13, 256  }
 0x49a   : > { %2741 = vsyncadd (%p2319_p7), %s1964_s13, 4294967040  ;;  %s28_s10 = sadd.s32 1, %s2764_s10   ;;  %s3394_s14 = sld [smem:[#allocation24_spill]] }
 0x49b   : > { %p25_p8 = scmp.ge.s32.totalorder %s28_s10, 5   ;;  %s3395_s27 = smov %s2748_s28 }
 0x49c   : > { %s3396_s28 = smov %s2752_s29  ;;  %s3397_s29 = smov %s2945_s12 }
 0x49d   : > { %s3398_s30 = smov %s2760_s9  ;;  %27 = sbr.rel (!%p25_p8) target bundleno = 14 (0xe), region = 135 }
 0x4a0   : > { %s3399_s9 = smov %s3394_s14 }
 0x4a2   :  { %1969 = vsyncpa [#allocation7], 1 }
 0x4a3   :  { %1971 = vsyncpa [#allocation7 + $0x1], 1 }
 0x4a4   :  { %1972 = vsyncpa [#allocation10], 1 }
 0x4a5   :  { %1973 = vsyncpa [#allocation13], 1 }
 0x4a6   :  { %1974 = vsyncpa [#allocation8], 1 }
 0x4a7   :  { %1976 = vsyncpa [#allocation8 + $0x1], 1 }
 0x4a8   :  { %1977 = vsyncpa [#allocation17], 1 }

</bundles_post_ra>
